<compile_context>
chip_gen: v7x
topology: tpu7x:2x2x1
jax: 0.10.0
libtpu: 0.0.40
codegen_flags: <defaults>
</compile_context>

<pallas_src>
import jax
import jax.numpy as jnp
from jax import lax
from jax.experimental import pallas as pl
from jax.experimental.pallas import tpu as pltpu


# ----------------------- fused CLSTM forward kernel -----------------------
def _clstm_fused_kernel(xp_ref, wconv_ref, bconv_ref, wih_ref, whh_ref,
                        blstm_ref, h0_ref, c0_ref, wlab_ref, blab_ref, o_ref):
    # xp_ref   : (Lp*B, D)   zero-padded, time-major flattened input rows
    #                        (row index = t_padded * B + b)
    # wconv_ref: (Kmax, D, C3)  packed, zero-extended conv weights (all convs)
    # bconv_ref: (1, C3)        concatenated conv biases
    # wih_ref  : (C3, 4H)       W_ih^T       whh_ref: (H, 4H)  W_hh^T
    # blstm_ref: (1, 4H)        b_ih + b_hh
    # h0/c0    : (B, H)
    # wlab_ref : (H, C)         hidden2label weight^T   blab_ref: (1, C)
    # o_ref    : (B, C)         log-softmax output
    B, H = h0_ref.shape
    kmax, _, C3 = wconv_ref.shape
    LB = xp_ref.shape[0] - (kmax - 1) * B       # L * B rows of valid output
    L = LB // B

    # ---- Conv (shifted matmuls over all B*L rows) + bias + ReLU ----
    acc = jnp.zeros((LB, C3), jnp.float32)
    for k in range(kmax):                       # static unroll, kmax is small
        xk = xp_ref[k * B:k * B + LB, :]        # (L*B, D) shifted window
        acc = acc + jnp.dot(xk, wconv_ref[k],
                            preferred_element_type=jnp.float32)
    feats = jnp.maximum(acc + bconv_ref[...], 0.0)            # (L*B, C3)

    # ---- Hoisted input projection: gate pre-activations for ALL steps ----
    g_all = (jnp.dot(feats, wih_ref[...],
                     preferred_element_type=jnp.float32)
             + blstm_ref[...])                                # (L*B, 4H)

    # ---- LSTM recurrence, fully unrolled; only h @ W_hh on serial path ----
    whh = whh_ref[...]                                        # load once
    h = h0_ref[...].astype(jnp.float32)
    c = c0_ref[...].astype(jnp.float32)
    for t in range(L):                                        # static unroll
        gates = g_all[t * B:(t + 1) * B, :] + jnp.dot(
            h, whh, preferred_element_type=jnp.float32)       # (B, 4H)
        i_g = jax.nn.sigmoid(gates[:, 0 * H:1 * H])
        f_g = jax.nn.sigmoid(gates[:, 1 * H:2 * H])
        g_g = jnp.tanh(gates[:, 2 * H:3 * H])
        o_g = jax.nn.sigmoid(gates[:, 3 * H:4 * H])
        c = f_g * c + i_g * g_g
        h = o_g * jnp.tanh(c)

    # ---- dropout(p=0.1) -> identity in eval mode; Linear; LogSoftmax ----
    logits = (jnp.dot(h, wlab_ref[...],
                      preferred_element_type=jnp.float32) + blab_ref[...])
    m = jnp.max(logits, axis=-1, keepdims=True)
    shifted = logits - m
    lse = jnp.log(jnp.sum(jnp.exp(shifted), axis=-1, keepdims=True))
    o_ref[...] = (shifted - lse).astype(o_ref.dtype)


def clstm_forward(x, w_all, bias_all, wih_t, whh_t, blstm, h0, c0,
                  wlab_t, blab, kmax):
    B, L, D = x.shape
    C3 = w_all.shape[-1]
    H = h0.shape[1]
    C = wlab_t.shape[1]
    pad = (kmax - 1) // 2

    # Time-major flatten + halo pad of the (tiny) input; XLA fuses this into
    # one cheap op before the single kernel launch.
    x_tm = jnp.transpose(x, (1, 0, 2)).reshape(L * B, D)
    xp = jnp.pad(x_tm, ((pad * B, pad * B), (0, 0)))
    LpB = (L + 2 * pad) * B

    return pl.pallas_call(
        _clstm_fused_kernel,
        out_shape=jax.ShapeDtypeStruct((B, C), jnp.float32),
        grid=(1,),
        in_specs=[
            pl.BlockSpec((LpB, D), lambda i: (0, 0)),
            pl.BlockSpec((kmax, D, C3), lambda i: (0, 0, 0)),
            pl.BlockSpec((1, C3), lambda i: (0, 0)),
            pl.BlockSpec((C3, 4 * H), lambda i: (0, 0)),
            pl.BlockSpec((H, 4 * H), lambda i: (0, 0)),
            pl.BlockSpec((1, 4 * H), lambda i: (0, 0)),
            pl.BlockSpec((B, H), lambda i: (0, 0)),
            pl.BlockSpec((B, H), lambda i: (0, 0)),
            pl.BlockSpec((H, C), lambda i: (0, 0)),
            pl.BlockSpec((1, C), lambda i: (0, 0)),
        ],
        out_specs=pl.BlockSpec((B, C), lambda i: (0, 0)),
        compiler_params=pltpu.CompilerParams(
            dimension_semantics=("arbitrary",)),
    )(xp, w_all, bias_all, wih_t, whh_t, blstm, h0, c0, wlab_t, blab)


# ------------------------------ parameter setup (glue) ------------------------------
def pack_conv_weights(conv_ws, conv_bs, KK, kmax):
    """Pack per-conv weights (Co, K, D) into one (Kmax, D, n*Co) tensor.

    Zero-extending a kernel of size K to Kmax (centered) and using padding
    (Kmax-1)//2 is mathematically identical to padding K//2 with the original
    kernel (all K in KK are odd), so one packed pass computes all convs.
    """
    n = len(KK)
    Co, _, D = conv_ws[0].shape
    w_all = jnp.zeros((kmax, D, n * Co), jnp.float32)
    for i, K in enumerate(KK):
        off = (kmax - K) // 2
        w_all = w_all.at[off:off + K, :, i * Co:(i + 1) * Co].set(
            jnp.transpose(conv_ws[i], (1, 2, 0)))
    bias_all = jnp.concatenate(conv_bs)[None, :]
    return w_all, bias_all


def init_params(key, D, Co, KK, H, C):
    n = len(KK)
    keys = jax.random.split(key, 2 * n + 6)
    conv_ws = [0.1 * jax.random.normal(keys[2 * i], (Co, K, D), jnp.float32)
               for i, K in enumerate(KK)]
    conv_bs = [0.1 * jax.random.normal(keys[2 * i + 1], (Co,), jnp.float32)
               for i in range(n)]
    F_in = n * Co
    w_ih = 0.1 * jax.random.normal(keys[2 * n + 0], (4 * H, F_in), jnp.float32)
    w_hh = 0.1 * jax.random.normal(keys[2 * n + 1], (4 * H, H), jnp.float32)
    b_ih = 0.1 * jax.random.normal(keys[2 * n + 2], (4 * H,), jnp.float32)
    b_hh = 0.1 * jax.random.normal(keys[2 * n + 3], (4 * H,), jnp.float32)
    w_lab = 0.1 * jax.random.normal(keys[2 * n + 4], (C, H), jnp.float32)
    b_lab = 0.1 * jax.random.normal(keys[2 * n + 5], (C,), jnp.float32)
    return conv_ws, conv_bs, w_ih, w_hh, b_ih, b_hh, w_lab, b_lab


# --------------------------- plain-JAX reference (for checking) ---------------------------
def clstm_reference(x, conv_ws, conv_bs, KK, w_ih, w_hh, b_ih, b_hh,
                    w_lab, b_lab, h0, c0):
    outs = []
    xin = x[:, None, :, :]  # (B, 1, L, D) NCHW
    for W, b, K in zip(conv_ws, conv_bs, KK):
        y = lax.conv_general_dilated(
            xin, W[:, None, :, :], window_strides=(1, 1),
            padding=((K // 2, K // 2), (0, 0)),
            dimension_numbers=("NCHW", "OIHW", "NCHW"))
        y = jax.nn.relu(y + b[None, :, None, None])  # (B, Co, L, 1)
        outs.append(y[..., 0])
    feats = jnp.transpose(jnp.concatenate(outs, axis=1), (0, 2, 1))  # (B, L, 3Co)
    H = h0.shape[1]

    def step(carry, x_t):
        h, c = carry
        gates = x_t @ w_ih.T + h @ w_hh.T + b_ih + b_hh
        i = jax.nn.sigmoid(gates[:, :H])
        f = jax.nn.sigmoid(gates[:, H:2 * H])
        g = jnp.tanh(gates[:, 2 * H:3 * H])
        o = jax.nn.sigmoid(gates[:, 3 * H:])
        c = f * c + i * g
        h = o * jnp.tanh(c)
        return (h, c), h

    (h_fin, _), _ = lax.scan(step, (h0, c0), jnp.transpose(feats, (1, 0, 2)))
    logits = h_fin @ w_lab.T + b_lab
    return jax.nn.log_softmax(logits, axis=-1)


# ------------------------------------- main -------------------------------------
if __name__ == "__main__":
    # Small shapes consistent with the module (scaled down).
    B, L = 2, 16           # batch, sequence length
    D = 32                 # embedding_dim
    Co = 16                # kernel_num
    Ks = [2, 3, 4]         # kernel_sizes -> KK = [3, 3, 5] (as in the module)
    H = 32                 # lstm_hidden_dim
    C = 2                  # output_size

    KK = [K + 1 if K % 2 == 0 else K for K in Ks]
    kmax = max(KK)

    key = jax.random.PRNGKey(0)
    kx, kh, kc, kp = jax.random.split(key, 4)
    x = jax.random.normal(kx, (B, L, D), jnp.float32)
    h0 = jax.random.normal(kh, (B, H), jnp.float32)  # deterministic init_hidden
    c0 = jax.random.normal(kc, (B, H), jnp.float32)

    (conv_ws, conv_bs, w_ih, w_hh, b_ih, b_hh, w_lab, b_lab) = init_params(
        kp, D, Co, KK, H, C)
    w_all, bias_all = pack_conv_weights(conv_ws, conv_bs, KK, kmax)

    # Single fused Pallas kernel: conv+relu -> input proj -> LSTM -> head.
    out = clstm_forward(x, w_all, bias_all, w_ih.T, w_hh.T,
                        (b_ih + b_hh)[None, :], h0, c0,
                        w_lab.T, b_lab[None, :], kmax)          # (B, C)
    out = jax.block_until_ready(out)

    ref = clstm_reference(x, conv_ws, conv_bs, KK, w_ih, w_hh, b_ih, b_hh,
                          w_lab, b_lab, h0, c0)
    assert out.shape == (B, C), out.shape
    max_err = float(jnp.max(jnp.abs(out - ref)))
    assert max_err < 5e-3, f"max abs error {max_err}"
    print("KERNEL_OK")
</pallas_src>

<mosaic_0001>
module attributes {stable_mosaic.version = 11 : i64} {
  func.func @_clstm_fused_kernel(%arg0: i32, %arg1: memref<40x32xf32, #tpu.memory_space<vmem>>, %arg2: memref<5x32x48xf32, #tpu.memory_space<vmem>>, %arg3: memref<1x48xf32, #tpu.memory_space<vmem>>, %arg4: memref<48x128xf32, #tpu.memory_space<vmem>>, %arg5: memref<32x128xf32, #tpu.memory_space<vmem>>, %arg6: memref<1x128xf32, #tpu.memory_space<vmem>>, %arg7: memref<2x32xf32, #tpu.memory_space<vmem>>, %arg8: memref<2x32xf32, #tpu.memory_space<vmem>>, %arg9: memref<32x2xf32, #tpu.memory_space<vmem>>, %arg10: memref<1x2xf32, #tpu.memory_space<vmem>>, %arg11: memref<2x2xf32, #tpu.memory_space<vmem>>) attributes {dimension_semantics = [#tpu.dimension_semantics<arbitrary>], iteration_bounds = array<i64: 1>, scalar_prefetch = 0 : i64, scratch_operands = 0 : i64, tpu.core_type = #tpu.core_type<tc>, window_params = [{pipeline_mode = #tpu.pipeline_mode<synchronous>, transform_indices = @transform_0, window_bounds = array<i64: 40, 32>}, {pipeline_mode = #tpu.pipeline_mode<synchronous>, transform_indices = @transform_1, window_bounds = array<i64: 5, 32, 48>}, {pipeline_mode = #tpu.pipeline_mode<synchronous>, transform_indices = @transform_2, window_bounds = array<i64: 1, 48>}, {pipeline_mode = #tpu.pipeline_mode<synchronous>, transform_indices = @transform_3, window_bounds = array<i64: 48, 128>}, {pipeline_mode = #tpu.pipeline_mode<synchronous>, transform_indices = @transform_4, window_bounds = array<i64: 32, 128>}, {pipeline_mode = #tpu.pipeline_mode<synchronous>, transform_indices = @transform_5, window_bounds = array<i64: 1, 128>}, {pipeline_mode = #tpu.pipeline_mode<synchronous>, transform_indices = @transform_6, window_bounds = array<i64: 2, 32>}, {pipeline_mode = #tpu.pipeline_mode<synchronous>, transform_indices = @transform_7, window_bounds = array<i64: 2, 32>}, {pipeline_mode = #tpu.pipeline_mode<synchronous>, transform_indices = @transform_8, window_bounds = array<i64: 32, 2>}, {pipeline_mode = #tpu.pipeline_mode<synchronous>, transform_indices = @transform_9, window_bounds = array<i64: 1, 2>}, {pipeline_mode = #tpu.pipeline_mode<synchronous>, transform_indices = @transform_10, window_bounds = array<i64: 2, 2>}]} {
    %cst = arith.constant 0.000000e+00 : f32
    %0 = vector.broadcast %cst : f32 to vector<32x48xf32>
    %c0 = arith.constant 0 : index
    %c0_0 = arith.constant 0 : index
    %1 = vector.load %arg1[%c0, %c0_0] : memref<40x32xf32, #tpu.memory_space<vmem>>, vector<32x32xf32>
    %c0_1 = arith.constant 0 : index
    %c0_2 = arith.constant 0 : index
    %c0_3 = arith.constant 0 : index
    %2 = vector.load %arg2[%c0_1, %c0_2, %c0_3] : memref<5x32x48xf32, #tpu.memory_space<vmem>>, vector<1x32x48xf32>
    %3 = vector.shape_cast %2 : vector<1x32x48xf32> to vector<32x48xf32>
    %cst_4 = arith.constant dense<0.000000e+00> : vector<32x48xf32>
    %4 = tpu.matmul %1, %3, %cst_4 {dimension_numbers = #tpu.dot_dimension_numbers<[1], [0], [0], [1], [0, 0, 1, 1], [], []>} : vector<32x32xf32>, vector<32x48xf32>, vector<32x48xf32> -> vector<32x48xf32>
    %5 = arith.addf %0, %4 : vector<32x48xf32>
    %c2 = arith.constant 2 : index
    %c0_5 = arith.constant 0 : index
    %6 = vector.load %arg1[%c2, %c0_5] : memref<40x32xf32, #tpu.memory_space<vmem>>, vector<32x32xf32>
    %c1 = arith.constant 1 : index
    %c0_6 = arith.constant 0 : index
    %c0_7 = arith.constant 0 : index
    %7 = vector.load %arg2[%c1, %c0_6, %c0_7] : memref<5x32x48xf32, #tpu.memory_space<vmem>>, vector<1x32x48xf32>
    %8 = vector.shape_cast %7 : vector<1x32x48xf32> to vector<32x48xf32>
    %cst_8 = arith.constant dense<0.000000e+00> : vector<32x48xf32>
    %9 = tpu.matmul %6, %8, %cst_8 {dimension_numbers = #tpu.dot_dimension_numbers<[1], [0], [0], [1], [0, 0, 1, 1], [], []>} : vector<32x32xf32>, vector<32x48xf32>, vector<32x48xf32> -> vector<32x48xf32>
    %10 = arith.addf %5, %9 : vector<32x48xf32>
    %c4 = arith.constant 4 : index
    %c0_9 = arith.constant 0 : index
    %11 = vector.load %arg1[%c4, %c0_9] : memref<40x32xf32, #tpu.memory_space<vmem>>, vector<32x32xf32>
    %c2_10 = arith.constant 2 : index
    %c0_11 = arith.constant 0 : index
    %c0_12 = arith.constant 0 : index
    %12 = vector.load %arg2[%c2_10, %c0_11, %c0_12] : memref<5x32x48xf32, #tpu.memory_space<vmem>>, vector<1x32x48xf32>
    %13 = vector.shape_cast %12 : vector<1x32x48xf32> to vector<32x48xf32>
    %cst_13 = arith.constant dense<0.000000e+00> : vector<32x48xf32>
    %14 = tpu.matmul %11, %13, %cst_13 {dimension_numbers = #tpu.dot_dimension_numbers<[1], [0], [0], [1], [0, 0, 1, 1], [], []>} : vector<32x32xf32>, vector<32x48xf32>, vector<32x48xf32> -> vector<32x48xf32>
    %15 = arith.addf %10, %14 : vector<32x48xf32>
    %c6 = arith.constant 6 : index
    %c0_14 = arith.constant 0 : index
    %16 = vector.load %arg1[%c6, %c0_14] : memref<40x32xf32, #tpu.memory_space<vmem>>, vector<32x32xf32>
    %c3 = arith.constant 3 : index
    %c0_15 = arith.constant 0 : index
    %c0_16 = arith.constant 0 : index
    %17 = vector.load %arg2[%c3, %c0_15, %c0_16] : memref<5x32x48xf32, #tpu.memory_space<vmem>>, vector<1x32x48xf32>
    %18 = vector.shape_cast %17 : vector<1x32x48xf32> to vector<32x48xf32>
    %cst_17 = arith.constant dense<0.000000e+00> : vector<32x48xf32>
    %19 = tpu.matmul %16, %18, %cst_17 {dimension_numbers = #tpu.dot_dimension_numbers<[1], [0], [0], [1], [0, 0, 1, 1], [], []>} : vector<32x32xf32>, vector<32x48xf32>, vector<32x48xf32> -> vector<32x48xf32>
    %20 = arith.addf %15, %19 : vector<32x48xf32>
    %c8 = arith.constant 8 : index
    %c0_18 = arith.constant 0 : index
    %21 = vector.load %arg1[%c8, %c0_18] : memref<40x32xf32, #tpu.memory_space<vmem>>, vector<32x32xf32>
    %c4_19 = arith.constant 4 : index
    %c0_20 = arith.constant 0 : index
    %c0_21 = arith.constant 0 : index
    %22 = vector.load %arg2[%c4_19, %c0_20, %c0_21] : memref<5x32x48xf32, #tpu.memory_space<vmem>>, vector<1x32x48xf32>
    %23 = vector.shape_cast %22 : vector<1x32x48xf32> to vector<32x48xf32>
    %cst_22 = arith.constant dense<0.000000e+00> : vector<32x48xf32>
    %24 = tpu.matmul %21, %23, %cst_22 {dimension_numbers = #tpu.dot_dimension_numbers<[1], [0], [0], [1], [0, 0, 1, 1], [], []>} : vector<32x32xf32>, vector<32x48xf32>, vector<32x48xf32> -> vector<32x48xf32>
    %25 = arith.addf %20, %24 : vector<32x48xf32>
    %c0_23 = arith.constant 0 : index
    %c0_24 = arith.constant 0 : index
    %26 = vector.load %arg3[%c0_23, %c0_24] : memref<1x48xf32, #tpu.memory_space<vmem>>, vector<1x48xf32>
    %27 = vector.broadcast %26 : vector<1x48xf32> to vector<32x48xf32>
    %28 = arith.addf %25, %27 : vector<32x48xf32>
    %cst_25 = arith.constant 0.000000e+00 : f32
    %29 = vector.broadcast %cst_25 : f32 to vector<32x48xf32>
    %30 = arith.maximumf %28, %29 : vector<32x48xf32>
    %c0_26 = arith.constant 0 : index
    %c0_27 = arith.constant 0 : index
    %31 = vector.load %arg4[%c0_26, %c0_27] : memref<48x128xf32, #tpu.memory_space<vmem>>, vector<48x128xf32>
    %cst_28 = arith.constant dense<0.000000e+00> : vector<32x128xf32>
    %32 = tpu.matmul %30, %31, %cst_28 {dimension_numbers = #tpu.dot_dimension_numbers<[1], [0], [0], [1], [0, 0, 1, 1], [], []>} : vector<32x48xf32>, vector<48x128xf32>, vector<32x128xf32> -> vector<32x128xf32>
    %c0_29 = arith.constant 0 : index
    %c0_30 = arith.constant 0 : index
    %33 = vector.load %arg6[%c0_29, %c0_30] : memref<1x128xf32, #tpu.memory_space<vmem>>, vector<1x128xf32>
    %34 = vector.broadcast %33 : vector<1x128xf32> to vector<32x128xf32>
    %35 = arith.addf %32, %34 : vector<32x128xf32>
    %c0_31 = arith.constant 0 : index
    %c0_32 = arith.constant 0 : index
    %36 = vector.load %arg5[%c0_31, %c0_32] : memref<32x128xf32, #tpu.memory_space<vmem>>, vector<32x128xf32>
    %c0_33 = arith.constant 0 : index
    %c0_34 = arith.constant 0 : index
    %37 = vector.load %arg7[%c0_33, %c0_34] : memref<2x32xf32, #tpu.memory_space<vmem>>, vector<2x32xf32>
    %c0_35 = arith.constant 0 : index
    %c0_36 = arith.constant 0 : index
    %38 = vector.load %arg8[%c0_35, %c0_36] : memref<2x32xf32, #tpu.memory_space<vmem>>, vector<2x32xf32>
    %39 = vector.extract_strided_slice %35 {offsets = [0, 0], sizes = [2, 128], strides = [1, 1]} : vector<32x128xf32> to vector<2x128xf32>
    %cst_37 = arith.constant dense<0.000000e+00> : vector<2x128xf32>
    %40 = tpu.matmul %37, %36, %cst_37 {dimension_numbers = #tpu.dot_dimension_numbers<[1], [0], [0], [1], [0, 0, 1, 1], [], []>} : vector<2x32xf32>, vector<32x128xf32>, vector<2x128xf32> -> vector<2x128xf32>
    %41 = arith.addf %39, %40 : vector<2x128xf32>
    %42 = vector.extract_strided_slice %41 {offsets = [0, 0], sizes = [2, 32], strides = [1, 1]} : vector<2x128xf32> to vector<2x32xf32>
    %43 = arith.negf %42 : vector<2x32xf32>
    %44 = math.exp %43 : vector<2x32xf32>
    %cst_38 = arith.constant 1.000000e+00 : f32
    %45 = vector.broadcast %cst_38 : f32 to vector<2x32xf32>
    %46 = arith.addf %45, %44 : vector<2x32xf32>
    %47 = arith.divf %45, %46 : vector<2x32xf32>
    %48 = vector.extract_strided_slice %41 {offsets = [0, 32], sizes = [2, 32], strides = [1, 1]} : vector<2x128xf32> to vector<2x32xf32>
    %49 = arith.negf %48 : vector<2x32xf32>
    %50 = math.exp %49 : vector<2x32xf32>
    %cst_39 = arith.constant 1.000000e+00 : f32
    %51 = vector.broadcast %cst_39 : f32 to vector<2x32xf32>
    %52 = arith.addf %51, %50 : vector<2x32xf32>
    %53 = arith.divf %51, %52 : vector<2x32xf32>
    %54 = vector.extract_strided_slice %41 {offsets = [0, 64], sizes = [2, 32], strides = [1, 1]} : vector<2x128xf32> to vector<2x32xf32>
    %55 = math.tanh %54 : vector<2x32xf32>
    %56 = vector.extract_strided_slice %41 {offsets = [0, 96], sizes = [2, 32], strides = [1, 1]} : vector<2x128xf32> to vector<2x32xf32>
    %57 = arith.negf %56 : vector<2x32xf32>
    %58 = math.exp %57 : vector<2x32xf32>
    %cst_40 = arith.constant 1.000000e+00 : f32
    %59 = vector.broadcast %cst_40 : f32 to vector<2x32xf32>
    %60 = arith.addf %59, %58 : vector<2x32xf32>
    %61 = arith.divf %59, %60 : vector<2x32xf32>
    %62 = arith.mulf %53, %38 : vector<2x32xf32>
    %63 = arith.mulf %47, %55 : vector<2x32xf32>
    %64 = arith.addf %62, %63 : vector<2x32xf32>
    %65 = math.tanh %64 : vector<2x32xf32>
    %66 = arith.mulf %61, %65 : vector<2x32xf32>
    %67 = vector.extract_strided_slice %35 {offsets = [2, 0], sizes = [2, 128], strides = [1, 1]} : vector<32x128xf32> to vector<2x128xf32>
    %cst_41 = arith.constant dense<0.000000e+00> : vector<2x128xf32>
    %68 = tpu.matmul %66, %36, %cst_41 {dimension_numbers = #tpu.dot_dimension_numbers<[1], [0], [0], [1], [0, 0, 1, 1], [], []>} : vector<2x32xf32>, vector<32x128xf32>, vector<2x128xf32> -> vector<2x128xf32>
    %69 = arith.addf %67, %68 : vector<2x128xf32>
    %70 = vector.extract_strided_slice %69 {offsets = [0, 0], sizes = [2, 32], strides = [1, 1]} : vector<2x128xf32> to vector<2x32xf32>
    %71 = arith.negf %70 : vector<2x32xf32>
    %72 = math.exp %71 : vector<2x32xf32>
    %cst_42 = arith.constant 1.000000e+00 : f32
    %73 = vector.broadcast %cst_42 : f32 to vector<2x32xf32>
    %74 = arith.addf %73, %72 : vector<2x32xf32>
    %75 = arith.divf %73, %74 : vector<2x32xf32>
    %76 = vector.extract_strided_slice %69 {offsets = [0, 32], sizes = [2, 32], strides = [1, 1]} : vector<2x128xf32> to vector<2x32xf32>
    %77 = arith.negf %76 : vector<2x32xf32>
    %78 = math.exp %77 : vector<2x32xf32>
    %cst_43 = arith.constant 1.000000e+00 : f32
    %79 = vector.broadcast %cst_43 : f32 to vector<2x32xf32>
    %80 = arith.addf %79, %78 : vector<2x32xf32>
    %81 = arith.divf %79, %80 : vector<2x32xf32>
    %82 = vector.extract_strided_slice %69 {offsets = [0, 64], sizes = [2, 32], strides = [1, 1]} : vector<2x128xf32> to vector<2x32xf32>
    %83 = math.tanh %82 : vector<2x32xf32>
    %84 = vector.extract_strided_slice %69 {offsets = [0, 96], sizes = [2, 32], strides = [1, 1]} : vector<2x128xf32> to vector<2x32xf32>
    %85 = arith.negf %84 : vector<2x32xf32>
    %86 = math.exp %85 : vector<2x32xf32>
    %cst_44 = arith.constant 1.000000e+00 : f32
    %87 = vector.broadcast %cst_44 : f32 to vector<2x32xf32>
    %88 = arith.addf %87, %86 : vector<2x32xf32>
    %89 = arith.divf %87, %88 : vector<2x32xf32>
    %90 = arith.mulf %81, %64 : vector<2x32xf32>
    %91 = arith.mulf %75, %83 : vector<2x32xf32>
    %92 = arith.addf %90, %91 : vector<2x32xf32>
    %93 = math.tanh %92 : vector<2x32xf32>
    %94 = arith.mulf %89, %93 : vector<2x32xf32>
    %95 = vector.extract_strided_slice %35 {offsets = [4, 0], sizes = [2, 128], strides = [1, 1]} : vector<32x128xf32> to vector<2x128xf32>
    %cst_45 = arith.constant dense<0.000000e+00> : vector<2x128xf32>
    %96 = tpu.matmul %94, %36, %cst_45 {dimension_numbers = #tpu.dot_dimension_numbers<[1], [0], [0], [1], [0, 0, 1, 1], [], []>} : vector<2x32xf32>, vector<32x128xf32>, vector<2x128xf32> -> vector<2x128xf32>
    %97 = arith.addf %95, %96 : vector<2x128xf32>
    %98 = vector.extract_strided_slice %97 {offsets = [0, 0], sizes = [2, 32], strides = [1, 1]} : vector<2x128xf32> to vector<2x32xf32>
    %99 = arith.negf %98 : vector<2x32xf32>
    %100 = math.exp %99 : vector<2x32xf32>
    %cst_46 = arith.constant 1.000000e+00 : f32
    %101 = vector.broadcast %cst_46 : f32 to vector<2x32xf32>
    %102 = arith.addf %101, %100 : vector<2x32xf32>
    %103 = arith.divf %101, %102 : vector<2x32xf32>
    %104 = vector.extract_strided_slice %97 {offsets = [0, 32], sizes = [2, 32], strides = [1, 1]} : vector<2x128xf32> to vector<2x32xf32>
    %105 = arith.negf %104 : vector<2x32xf32>
    %106 = math.exp %105 : vector<2x32xf32>
    %cst_47 = arith.constant 1.000000e+00 : f32
    %107 = vector.broadcast %cst_47 : f32 to vector<2x32xf32>
    %108 = arith.addf %107, %106 : vector<2x32xf32>
    %109 = arith.divf %107, %108 : vector<2x32xf32>
    %110 = vector.extract_strided_slice %97 {offsets = [0, 64], sizes = [2, 32], strides = [1, 1]} : vector<2x128xf32> to vector<2x32xf32>
    %111 = math.tanh %110 : vector<2x32xf32>
    %112 = vector.extract_strided_slice %97 {offsets = [0, 96], sizes = [2, 32], strides = [1, 1]} : vector<2x128xf32> to vector<2x32xf32>
    %113 = arith.negf %112 : vector<2x32xf32>
    %114 = math.exp %113 : vector<2x32xf32>
    %cst_48 = arith.constant 1.000000e+00 : f32
    %115 = vector.broadcast %cst_48 : f32 to vector<2x32xf32>
    %116 = arith.addf %115, %114 : vector<2x32xf32>
    %117 = arith.divf %115, %116 : vector<2x32xf32>
    %118 = arith.mulf %109, %92 : vector<2x32xf32>
    %119 = arith.mulf %103, %111 : vector<2x32xf32>
    %120 = arith.addf %118, %119 : vector<2x32xf32>
    %121 = math.tanh %120 : vector<2x32xf32>
    %122 = arith.mulf %117, %121 : vector<2x32xf32>
    %123 = vector.extract_strided_slice %35 {offsets = [6, 0], sizes = [2, 128], strides = [1, 1]} : vector<32x128xf32> to vector<2x128xf32>
    %cst_49 = arith.constant dense<0.000000e+00> : vector<2x128xf32>
    %124 = tpu.matmul %122, %36, %cst_49 {dimension_numbers = #tpu.dot_dimension_numbers<[1], [0], [0], [1], [0, 0, 1, 1], [], []>} : vector<2x32xf32>, vector<32x128xf32>, vector<2x128xf32> -> vector<2x128xf32>
    %125 = arith.addf %123, %124 : vector<2x128xf32>
    %126 = vector.extract_strided_slice %125 {offsets = [0, 0], sizes = [2, 32], strides = [1, 1]} : vector<2x128xf32> to vector<2x32xf32>
    %127 = arith.negf %126 : vector<2x32xf32>
    %128 = math.exp %127 : vector<2x32xf32>
    %cst_50 = arith.constant 1.000000e+00 : f32
    %129 = vector.broadcast %cst_50 : f32 to vector<2x32xf32>
    %130 = arith.addf %129, %128 : vector<2x32xf32>
    %131 = arith.divf %129, %130 : vector<2x32xf32>
    %132 = vector.extract_strided_slice %125 {offsets = [0, 32], sizes = [2, 32], strides = [1, 1]} : vector<2x128xf32> to vector<2x32xf32>
    %133 = arith.negf %132 : vector<2x32xf32>
    %134 = math.exp %133 : vector<2x32xf32>
    %cst_51 = arith.constant 1.000000e+00 : f32
    %135 = vector.broadcast %cst_51 : f32 to vector<2x32xf32>
    %136 = arith.addf %135, %134 : vector<2x32xf32>
    %137 = arith.divf %135, %136 : vector<2x32xf32>
    %138 = vector.extract_strided_slice %125 {offsets = [0, 64], sizes = [2, 32], strides = [1, 1]} : vector<2x128xf32> to vector<2x32xf32>
    %139 = math.tanh %138 : vector<2x32xf32>
    %140 = vector.extract_strided_slice %125 {offsets = [0, 96], sizes = [2, 32], strides = [1, 1]} : vector<2x128xf32> to vector<2x32xf32>
    %141 = arith.negf %140 : vector<2x32xf32>
    %142 = math.exp %141 : vector<2x32xf32>
    %cst_52 = arith.constant 1.000000e+00 : f32
    %143 = vector.broadcast %cst_52 : f32 to vector<2x32xf32>
    %144 = arith.addf %143, %142 : vector<2x32xf32>
    %145 = arith.divf %143, %144 : vector<2x32xf32>
    %146 = arith.mulf %137, %120 : vector<2x32xf32>
    %147 = arith.mulf %131, %139 : vector<2x32xf32>
    %148 = arith.addf %146, %147 : vector<2x32xf32>
    %149 = math.tanh %148 : vector<2x32xf32>
    %150 = arith.mulf %145, %149 : vector<2x32xf32>
    %151 = vector.extract_strided_slice %35 {offsets = [8, 0], sizes = [2, 128], strides = [1, 1]} : vector<32x128xf32> to vector<2x128xf32>
    %cst_53 = arith.constant dense<0.000000e+00> : vector<2x128xf32>
    %152 = tpu.matmul %150, %36, %cst_53 {dimension_numbers = #tpu.dot_dimension_numbers<[1], [0], [0], [1], [0, 0, 1, 1], [], []>} : vector<2x32xf32>, vector<32x128xf32>, vector<2x128xf32> -> vector<2x128xf32>
    %153 = arith.addf %151, %152 : vector<2x128xf32>
    %154 = vector.extract_strided_slice %153 {offsets = [0, 0], sizes = [2, 32], strides = [1, 1]} : vector<2x128xf32> to vector<2x32xf32>
    %155 = arith.negf %154 : vector<2x32xf32>
    %156 = math.exp %155 : vector<2x32xf32>
    %cst_54 = arith.constant 1.000000e+00 : f32
    %157 = vector.broadcast %cst_54 : f32 to vector<2x32xf32>
    %158 = arith.addf %157, %156 : vector<2x32xf32>
    %159 = arith.divf %157, %158 : vector<2x32xf32>
    %160 = vector.extract_strided_slice %153 {offsets = [0, 32], sizes = [2, 32], strides = [1, 1]} : vector<2x128xf32> to vector<2x32xf32>
    %161 = arith.negf %160 : vector<2x32xf32>
    %162 = math.exp %161 : vector<2x32xf32>
    %cst_55 = arith.constant 1.000000e+00 : f32
    %163 = vector.broadcast %cst_55 : f32 to vector<2x32xf32>
    %164 = arith.addf %163, %162 : vector<2x32xf32>
    %165 = arith.divf %163, %164 : vector<2x32xf32>
    %166 = vector.extract_strided_slice %153 {offsets = [0, 64], sizes = [2, 32], strides = [1, 1]} : vector<2x128xf32> to vector<2x32xf32>
    %167 = math.tanh %166 : vector<2x32xf32>
    %168 = vector.extract_strided_slice %153 {offsets = [0, 96], sizes = [2, 32], strides = [1, 1]} : vector<2x128xf32> to vector<2x32xf32>
    %169 = arith.negf %168 : vector<2x32xf32>
    %170 = math.exp %169 : vector<2x32xf32>
    %cst_56 = arith.constant 1.000000e+00 : f32
    %171 = vector.broadcast %cst_56 : f32 to vector<2x32xf32>
    %172 = arith.addf %171, %170 : vector<2x32xf32>
    %173 = arith.divf %171, %172 : vector<2x32xf32>
    %174 = arith.mulf %165, %148 : vector<2x32xf32>
    %175 = arith.mulf %159, %167 : vector<2x32xf32>
    %176 = arith.addf %174, %175 : vector<2x32xf32>
    %177 = math.tanh %176 : vector<2x32xf32>
    %178 = arith.mulf %173, %177 : vector<2x32xf32>
    %179 = vector.extract_strided_slice %35 {offsets = [10, 0], sizes = [2, 128], strides = [1, 1]} : vector<32x128xf32> to vector<2x128xf32>
    %cst_57 = arith.constant dense<0.000000e+00> : vector<2x128xf32>
    %180 = tpu.matmul %178, %36, %cst_57 {dimension_numbers = #tpu.dot_dimension_numbers<[1], [0], [0], [1], [0, 0, 1, 1], [], []>} : vector<2x32xf32>, vector<32x128xf32>, vector<2x128xf32> -> vector<2x128xf32>
    %181 = arith.addf %179, %180 : vector<2x128xf32>
    %182 = vector.extract_strided_slice %181 {offsets = [0, 0], sizes = [2, 32], strides = [1, 1]} : vector<2x128xf32> to vector<2x32xf32>
    %183 = arith.negf %182 : vector<2x32xf32>
    %184 = math.exp %183 : vector<2x32xf32>
    %cst_58 = arith.constant 1.000000e+00 : f32
    %185 = vector.broadcast %cst_58 : f32 to vector<2x32xf32>
    %186 = arith.addf %185, %184 : vector<2x32xf32>
    %187 = arith.divf %185, %186 : vector<2x32xf32>
    %188 = vector.extract_strided_slice %181 {offsets = [0, 32], sizes = [2, 32], strides = [1, 1]} : vector<2x128xf32> to vector<2x32xf32>
    %189 = arith.negf %188 : vector<2x32xf32>
    %190 = math.exp %189 : vector<2x32xf32>
    %cst_59 = arith.constant 1.000000e+00 : f32
    %191 = vector.broadcast %cst_59 : f32 to vector<2x32xf32>
    %192 = arith.addf %191, %190 : vector<2x32xf32>
    %193 = arith.divf %191, %192 : vector<2x32xf32>
    %194 = vector.extract_strided_slice %181 {offsets = [0, 64], sizes = [2, 32], strides = [1, 1]} : vector<2x128xf32> to vector<2x32xf32>
    %195 = math.tanh %194 : vector<2x32xf32>
    %196 = vector.extract_strided_slice %181 {offsets = [0, 96], sizes = [2, 32], strides = [1, 1]} : vector<2x128xf32> to vector<2x32xf32>
    %197 = arith.negf %196 : vector<2x32xf32>
    %198 = math.exp %197 : vector<2x32xf32>
    %cst_60 = arith.constant 1.000000e+00 : f32
    %199 = vector.broadcast %cst_60 : f32 to vector<2x32xf32>
    %200 = arith.addf %199, %198 : vector<2x32xf32>
    %201 = arith.divf %199, %200 : vector<2x32xf32>
    %202 = arith.mulf %193, %176 : vector<2x32xf32>
    %203 = arith.mulf %187, %195 : vector<2x32xf32>
    %204 = arith.addf %202, %203 : vector<2x32xf32>
    %205 = math.tanh %204 : vector<2x32xf32>
    %206 = arith.mulf %201, %205 : vector<2x32xf32>
    %207 = vector.extract_strided_slice %35 {offsets = [12, 0], sizes = [2, 128], strides = [1, 1]} : vector<32x128xf32> to vector<2x128xf32>
    %cst_61 = arith.constant dense<0.000000e+00> : vector<2x128xf32>
    %208 = tpu.matmul %206, %36, %cst_61 {dimension_numbers = #tpu.dot_dimension_numbers<[1], [0], [0], [1], [0, 0, 1, 1], [], []>} : vector<2x32xf32>, vector<32x128xf32>, vector<2x128xf32> -> vector<2x128xf32>
    %209 = arith.addf %207, %208 : vector<2x128xf32>
    %210 = vector.extract_strided_slice %209 {offsets = [0, 0], sizes = [2, 32], strides = [1, 1]} : vector<2x128xf32> to vector<2x32xf32>
    %211 = arith.negf %210 : vector<2x32xf32>
    %212 = math.exp %211 : vector<2x32xf32>
    %cst_62 = arith.constant 1.000000e+00 : f32
    %213 = vector.broadcast %cst_62 : f32 to vector<2x32xf32>
    %214 = arith.addf %213, %212 : vector<2x32xf32>
    %215 = arith.divf %213, %214 : vector<2x32xf32>
    %216 = vector.extract_strided_slice %209 {offsets = [0, 32], sizes = [2, 32], strides = [1, 1]} : vector<2x128xf32> to vector<2x32xf32>
    %217 = arith.negf %216 : vector<2x32xf32>
    %218 = math.exp %217 : vector<2x32xf32>
    %cst_63 = arith.constant 1.000000e+00 : f32
    %219 = vector.broadcast %cst_63 : f32 to vector<2x32xf32>
    %220 = arith.addf %219, %218 : vector<2x32xf32>
    %221 = arith.divf %219, %220 : vector<2x32xf32>
    %222 = vector.extract_strided_slice %209 {offsets = [0, 64], sizes = [2, 32], strides = [1, 1]} : vector<2x128xf32> to vector<2x32xf32>
    %223 = math.tanh %222 : vector<2x32xf32>
    %224 = vector.extract_strided_slice %209 {offsets = [0, 96], sizes = [2, 32], strides = [1, 1]} : vector<2x128xf32> to vector<2x32xf32>
    %225 = arith.negf %224 : vector<2x32xf32>
    %226 = math.exp %225 : vector<2x32xf32>
    %cst_64 = arith.constant 1.000000e+00 : f32
    %227 = vector.broadcast %cst_64 : f32 to vector<2x32xf32>
    %228 = arith.addf %227, %226 : vector<2x32xf32>
    %229 = arith.divf %227, %228 : vector<2x32xf32>
    %230 = arith.mulf %221, %204 : vector<2x32xf32>
    %231 = arith.mulf %215, %223 : vector<2x32xf32>
    %232 = arith.addf %230, %231 : vector<2x32xf32>
    %233 = math.tanh %232 : vector<2x32xf32>
    %234 = arith.mulf %229, %233 : vector<2x32xf32>
    %235 = vector.extract_strided_slice %35 {offsets = [14, 0], sizes = [2, 128], strides = [1, 1]} : vector<32x128xf32> to vector<2x128xf32>
    %cst_65 = arith.constant dense<0.000000e+00> : vector<2x128xf32>
    %236 = tpu.matmul %234, %36, %cst_65 {dimension_numbers = #tpu.dot_dimension_numbers<[1], [0], [0], [1], [0, 0, 1, 1], [], []>} : vector<2x32xf32>, vector<32x128xf32>, vector<2x128xf32> -> vector<2x128xf32>
    %237 = arith.addf %235, %236 : vector<2x128xf32>
    %238 = vector.extract_strided_slice %237 {offsets = [0, 0], sizes = [2, 32], strides = [1, 1]} : vector<2x128xf32> to vector<2x32xf32>
    %239 = arith.negf %238 : vector<2x32xf32>
    %240 = math.exp %239 : vector<2x32xf32>
    %cst_66 = arith.constant 1.000000e+00 : f32
    %241 = vector.broadcast %cst_66 : f32 to vector<2x32xf32>
    %242 = arith.addf %241, %240 : vector<2x32xf32>
    %243 = arith.divf %241, %242 : vector<2x32xf32>
    %244 = vector.extract_strided_slice %237 {offsets = [0, 32], sizes = [2, 32], strides = [1, 1]} : vector<2x128xf32> to vector<2x32xf32>
    %245 = arith.negf %244 : vector<2x32xf32>
    %246 = math.exp %245 : vector<2x32xf32>
    %cst_67 = arith.constant 1.000000e+00 : f32
    %247 = vector.broadcast %cst_67 : f32 to vector<2x32xf32>
    %248 = arith.addf %247, %246 : vector<2x32xf32>
    %249 = arith.divf %247, %248 : vector<2x32xf32>
    %250 = vector.extract_strided_slice %237 {offsets = [0, 64], sizes = [2, 32], strides = [1, 1]} : vector<2x128xf32> to vector<2x32xf32>
    %251 = math.tanh %250 : vector<2x32xf32>
    %252 = vector.extract_strided_slice %237 {offsets = [0, 96], sizes = [2, 32], strides = [1, 1]} : vector<2x128xf32> to vector<2x32xf32>
    %253 = arith.negf %252 : vector<2x32xf32>
    %254 = math.exp %253 : vector<2x32xf32>
    %cst_68 = arith.constant 1.000000e+00 : f32
    %255 = vector.broadcast %cst_68 : f32 to vector<2x32xf32>
    %256 = arith.addf %255, %254 : vector<2x32xf32>
    %257 = arith.divf %255, %256 : vector<2x32xf32>
    %258 = arith.mulf %249, %232 : vector<2x32xf32>
    %259 = arith.mulf %243, %251 : vector<2x32xf32>
    %260 = arith.addf %258, %259 : vector<2x32xf32>
    %261 = math.tanh %260 : vector<2x32xf32>
    %262 = arith.mulf %257, %261 : vector<2x32xf32>
    %263 = vector.extract_strided_slice %35 {offsets = [16, 0], sizes = [2, 128], strides = [1, 1]} : vector<32x128xf32> to vector<2x128xf32>
    %cst_69 = arith.constant dense<0.000000e+00> : vector<2x128xf32>
    %264 = tpu.matmul %262, %36, %cst_69 {dimension_numbers = #tpu.dot_dimension_numbers<[1], [0], [0], [1], [0, 0, 1, 1], [], []>} : vector<2x32xf32>, vector<32x128xf32>, vector<2x128xf32> -> vector<2x128xf32>
    %265 = arith.addf %263, %264 : vector<2x128xf32>
    %266 = vector.extract_strided_slice %265 {offsets = [0, 0], sizes = [2, 32], strides = [1, 1]} : vector<2x128xf32> to vector<2x32xf32>
    %267 = arith.negf %266 : vector<2x32xf32>
    %268 = math.exp %267 : vector<2x32xf32>
    %cst_70 = arith.constant 1.000000e+00 : f32
    %269 = vector.broadcast %cst_70 : f32 to vector<2x32xf32>
    %270 = arith.addf %269, %268 : vector<2x32xf32>
    %271 = arith.divf %269, %270 : vector<2x32xf32>
    %272 = vector.extract_strided_slice %265 {offsets = [0, 32], sizes = [2, 32], strides = [1, 1]} : vector<2x128xf32> to vector<2x32xf32>
    %273 = arith.negf %272 : vector<2x32xf32>
    %274 = math.exp %273 : vector<2x32xf32>
    %cst_71 = arith.constant 1.000000e+00 : f32
    %275 = vector.broadcast %cst_71 : f32 to vector<2x32xf32>
    %276 = arith.addf %275, %274 : vector<2x32xf32>
    %277 = arith.divf %275, %276 : vector<2x32xf32>
    %278 = vector.extract_strided_slice %265 {offsets = [0, 64], sizes = [2, 32], strides = [1, 1]} : vector<2x128xf32> to vector<2x32xf32>
    %279 = math.tanh %278 : vector<2x32xf32>
    %280 = vector.extract_strided_slice %265 {offsets = [0, 96], sizes = [2, 32], strides = [1, 1]} : vector<2x128xf32> to vector<2x32xf32>
    %281 = arith.negf %280 : vector<2x32xf32>
    %282 = math.exp %281 : vector<2x32xf32>
    %cst_72 = arith.constant 1.000000e+00 : f32
    %283 = vector.broadcast %cst_72 : f32 to vector<2x32xf32>
    %284 = arith.addf %283, %282 : vector<2x32xf32>
    %285 = arith.divf %283, %284 : vector<2x32xf32>
    %286 = arith.mulf %277, %260 : vector<2x32xf32>
    %287 = arith.mulf %271, %279 : vector<2x32xf32>
    %288 = arith.addf %286, %287 : vector<2x32xf32>
    %289 = math.tanh %288 : vector<2x32xf32>
    %290 = arith.mulf %285, %289 : vector<2x32xf32>
    %291 = vector.extract_strided_slice %35 {offsets = [18, 0], sizes = [2, 128], strides = [1, 1]} : vector<32x128xf32> to vector<2x128xf32>
    %cst_73 = arith.constant dense<0.000000e+00> : vector<2x128xf32>
    %292 = tpu.matmul %290, %36, %cst_73 {dimension_numbers = #tpu.dot_dimension_numbers<[1], [0], [0], [1], [0, 0, 1, 1], [], []>} : vector<2x32xf32>, vector<32x128xf32>, vector<2x128xf32> -> vector<2x128xf32>
    %293 = arith.addf %291, %292 : vector<2x128xf32>
    %294 = vector.extract_strided_slice %293 {offsets = [0, 0], sizes = [2, 32], strides = [1, 1]} : vector<2x128xf32> to vector<2x32xf32>
    %295 = arith.negf %294 : vector<2x32xf32>
    %296 = math.exp %295 : vector<2x32xf32>
    %cst_74 = arith.constant 1.000000e+00 : f32
    %297 = vector.broadcast %cst_74 : f32 to vector<2x32xf32>
    %298 = arith.addf %297, %296 : vector<2x32xf32>
    %299 = arith.divf %297, %298 : vector<2x32xf32>
    %300 = vector.extract_strided_slice %293 {offsets = [0, 32], sizes = [2, 32], strides = [1, 1]} : vector<2x128xf32> to vector<2x32xf32>
    %301 = arith.negf %300 : vector<2x32xf32>
    %302 = math.exp %301 : vector<2x32xf32>
    %cst_75 = arith.constant 1.000000e+00 : f32
    %303 = vector.broadcast %cst_75 : f32 to vector<2x32xf32>
    %304 = arith.addf %303, %302 : vector<2x32xf32>
    %305 = arith.divf %303, %304 : vector<2x32xf32>
    %306 = vector.extract_strided_slice %293 {offsets = [0, 64], sizes = [2, 32], strides = [1, 1]} : vector<2x128xf32> to vector<2x32xf32>
    %307 = math.tanh %306 : vector<2x32xf32>
    %308 = vector.extract_strided_slice %293 {offsets = [0, 96], sizes = [2, 32], strides = [1, 1]} : vector<2x128xf32> to vector<2x32xf32>
    %309 = arith.negf %308 : vector<2x32xf32>
    %310 = math.exp %309 : vector<2x32xf32>
    %cst_76 = arith.constant 1.000000e+00 : f32
    %311 = vector.broadcast %cst_76 : f32 to vector<2x32xf32>
    %312 = arith.addf %311, %310 : vector<2x32xf32>
    %313 = arith.divf %311, %312 : vector<2x32xf32>
    %314 = arith.mulf %305, %288 : vector<2x32xf32>
    %315 = arith.mulf %299, %307 : vector<2x32xf32>
    %316 = arith.addf %314, %315 : vector<2x32xf32>
    %317 = math.tanh %316 : vector<2x32xf32>
    %318 = arith.mulf %313, %317 : vector<2x32xf32>
    %319 = vector.extract_strided_slice %35 {offsets = [20, 0], sizes = [2, 128], strides = [1, 1]} : vector<32x128xf32> to vector<2x128xf32>
    %cst_77 = arith.constant dense<0.000000e+00> : vector<2x128xf32>
    %320 = tpu.matmul %318, %36, %cst_77 {dimension_numbers = #tpu.dot_dimension_numbers<[1], [0], [0], [1], [0, 0, 1, 1], [], []>} : vector<2x32xf32>, vector<32x128xf32>, vector<2x128xf32> -> vector<2x128xf32>
    %321 = arith.addf %319, %320 : vector<2x128xf32>
    %322 = vector.extract_strided_slice %321 {offsets = [0, 0], sizes = [2, 32], strides = [1, 1]} : vector<2x128xf32> to vector<2x32xf32>
    %323 = arith.negf %322 : vector<2x32xf32>
    %324 = math.exp %323 : vector<2x32xf32>
    %cst_78 = arith.constant 1.000000e+00 : f32
    %325 = vector.broadcast %cst_78 : f32 to vector<2x32xf32>
    %326 = arith.addf %325, %324 : vector<2x32xf32>
    %327 = arith.divf %325, %326 : vector<2x32xf32>
    %328 = vector.extract_strided_slice %321 {offsets = [0, 32], sizes = [2, 32], strides = [1, 1]} : vector<2x128xf32> to vector<2x32xf32>
    %329 = arith.negf %328 : vector<2x32xf32>
    %330 = math.exp %329 : vector<2x32xf32>
    %cst_79 = arith.constant 1.000000e+00 : f32
    %331 = vector.broadcast %cst_79 : f32 to vector<2x32xf32>
    %332 = arith.addf %331, %330 : vector<2x32xf32>
    %333 = arith.divf %331, %332 : vector<2x32xf32>
    %334 = vector.extract_strided_slice %321 {offsets = [0, 64], sizes = [2, 32], strides = [1, 1]} : vector<2x128xf32> to vector<2x32xf32>
    %335 = math.tanh %334 : vector<2x32xf32>
    %336 = vector.extract_strided_slice %321 {offsets = [0, 96], sizes = [2, 32], strides = [1, 1]} : vector<2x128xf32> to vector<2x32xf32>
    %337 = arith.negf %336 : vector<2x32xf32>
    %338 = math.exp %337 : vector<2x32xf32>
    %cst_80 = arith.constant 1.000000e+00 : f32
    %339 = vector.broadcast %cst_80 : f32 to vector<2x32xf32>
    %340 = arith.addf %339, %338 : vector<2x32xf32>
    %341 = arith.divf %339, %340 : vector<2x32xf32>
    %342 = arith.mulf %333, %316 : vector<2x32xf32>
    %343 = arith.mulf %327, %335 : vector<2x32xf32>
    %344 = arith.addf %342, %343 : vector<2x32xf32>
    %345 = math.tanh %344 : vector<2x32xf32>
    %346 = arith.mulf %341, %345 : vector<2x32xf32>
    %347 = vector.extract_strided_slice %35 {offsets = [22, 0], sizes = [2, 128], strides = [1, 1]} : vector<32x128xf32> to vector<2x128xf32>
    %cst_81 = arith.constant dense<0.000000e+00> : vector<2x128xf32>
    %348 = tpu.matmul %346, %36, %cst_81 {dimension_numbers = #tpu.dot_dimension_numbers<[1], [0], [0], [1], [0, 0, 1, 1], [], []>} : vector<2x32xf32>, vector<32x128xf32>, vector<2x128xf32> -> vector<2x128xf32>
    %349 = arith.addf %347, %348 : vector<2x128xf32>
    %350 = vector.extract_strided_slice %349 {offsets = [0, 0], sizes = [2, 32], strides = [1, 1]} : vector<2x128xf32> to vector<2x32xf32>
    %351 = arith.negf %350 : vector<2x32xf32>
    %352 = math.exp %351 : vector<2x32xf32>
    %cst_82 = arith.constant 1.000000e+00 : f32
    %353 = vector.broadcast %cst_82 : f32 to vector<2x32xf32>
    %354 = arith.addf %353, %352 : vector<2x32xf32>
    %355 = arith.divf %353, %354 : vector<2x32xf32>
    %356 = vector.extract_strided_slice %349 {offsets = [0, 32], sizes = [2, 32], strides = [1, 1]} : vector<2x128xf32> to vector<2x32xf32>
    %357 = arith.negf %356 : vector<2x32xf32>
    %358 = math.exp %357 : vector<2x32xf32>
    %cst_83 = arith.constant 1.000000e+00 : f32
    %359 = vector.broadcast %cst_83 : f32 to vector<2x32xf32>
    %360 = arith.addf %359, %358 : vector<2x32xf32>
    %361 = arith.divf %359, %360 : vector<2x32xf32>
    %362 = vector.extract_strided_slice %349 {offsets = [0, 64], sizes = [2, 32], strides = [1, 1]} : vector<2x128xf32> to vector<2x32xf32>
    %363 = math.tanh %362 : vector<2x32xf32>
    %364 = vector.extract_strided_slice %349 {offsets = [0, 96], sizes = [2, 32], strides = [1, 1]} : vector<2x128xf32> to vector<2x32xf32>
    %365 = arith.negf %364 : vector<2x32xf32>
    %366 = math.exp %365 : vector<2x32xf32>
    %cst_84 = arith.constant 1.000000e+00 : f32
    %367 = vector.broadcast %cst_84 : f32 to vector<2x32xf32>
    %368 = arith.addf %367, %366 : vector<2x32xf32>
    %369 = arith.divf %367, %368 : vector<2x32xf32>
    %370 = arith.mulf %361, %344 : vector<2x32xf32>
    %371 = arith.mulf %355, %363 : vector<2x32xf32>
    %372 = arith.addf %370, %371 : vector<2x32xf32>
    %373 = math.tanh %372 : vector<2x32xf32>
    %374 = arith.mulf %369, %373 : vector<2x32xf32>
    %375 = vector.extract_strided_slice %35 {offsets = [24, 0], sizes = [2, 128], strides = [1, 1]} : vector<32x128xf32> to vector<2x128xf32>
    %cst_85 = arith.constant dense<0.000000e+00> : vector<2x128xf32>
    %376 = tpu.matmul %374, %36, %cst_85 {dimension_numbers = #tpu.dot_dimension_numbers<[1], [0], [0], [1], [0, 0, 1, 1], [], []>} : vector<2x32xf32>, vector<32x128xf32>, vector<2x128xf32> -> vector<2x128xf32>
    %377 = arith.addf %375, %376 : vector<2x128xf32>
    %378 = vector.extract_strided_slice %377 {offsets = [0, 0], sizes = [2, 32], strides = [1, 1]} : vector<2x128xf32> to vector<2x32xf32>
    %379 = arith.negf %378 : vector<2x32xf32>
    %380 = math.exp %379 : vector<2x32xf32>
    %cst_86 = arith.constant 1.000000e+00 : f32
    %381 = vector.broadcast %cst_86 : f32 to vector<2x32xf32>
    %382 = arith.addf %381, %380 : vector<2x32xf32>
    %383 = arith.divf %381, %382 : vector<2x32xf32>
    %384 = vector.extract_strided_slice %377 {offsets = [0, 32], sizes = [2, 32], strides = [1, 1]} : vector<2x128xf32> to vector<2x32xf32>
    %385 = arith.negf %384 : vector<2x32xf32>
    %386 = math.exp %385 : vector<2x32xf32>
    %cst_87 = arith.constant 1.000000e+00 : f32
    %387 = vector.broadcast %cst_87 : f32 to vector<2x32xf32>
    %388 = arith.addf %387, %386 : vector<2x32xf32>
    %389 = arith.divf %387, %388 : vector<2x32xf32>
    %390 = vector.extract_strided_slice %377 {offsets = [0, 64], sizes = [2, 32], strides = [1, 1]} : vector<2x128xf32> to vector<2x32xf32>
    %391 = math.tanh %390 : vector<2x32xf32>
    %392 = vector.extract_strided_slice %377 {offsets = [0, 96], sizes = [2, 32], strides = [1, 1]} : vector<2x128xf32> to vector<2x32xf32>
    %393 = arith.negf %392 : vector<2x32xf32>
    %394 = math.exp %393 : vector<2x32xf32>
    %cst_88 = arith.constant 1.000000e+00 : f32
    %395 = vector.broadcast %cst_88 : f32 to vector<2x32xf32>
    %396 = arith.addf %395, %394 : vector<2x32xf32>
    %397 = arith.divf %395, %396 : vector<2x32xf32>
    %398 = arith.mulf %389, %372 : vector<2x32xf32>
    %399 = arith.mulf %383, %391 : vector<2x32xf32>
    %400 = arith.addf %398, %399 : vector<2x32xf32>
    %401 = math.tanh %400 : vector<2x32xf32>
    %402 = arith.mulf %397, %401 : vector<2x32xf32>
    %403 = vector.extract_strided_slice %35 {offsets = [26, 0], sizes = [2, 128], strides = [1, 1]} : vector<32x128xf32> to vector<2x128xf32>
    %cst_89 = arith.constant dense<0.000000e+00> : vector<2x128xf32>
    %404 = tpu.matmul %402, %36, %cst_89 {dimension_numbers = #tpu.dot_dimension_numbers<[1], [0], [0], [1], [0, 0, 1, 1], [], []>} : vector<2x32xf32>, vector<32x128xf32>, vector<2x128xf32> -> vector<2x128xf32>
    %405 = arith.addf %403, %404 : vector<2x128xf32>
    %406 = vector.extract_strided_slice %405 {offsets = [0, 0], sizes = [2, 32], strides = [1, 1]} : vector<2x128xf32> to vector<2x32xf32>
    %407 = arith.negf %406 : vector<2x32xf32>
    %408 = math.exp %407 : vector<2x32xf32>
    %cst_90 = arith.constant 1.000000e+00 : f32
    %409 = vector.broadcast %cst_90 : f32 to vector<2x32xf32>
    %410 = arith.addf %409, %408 : vector<2x32xf32>
    %411 = arith.divf %409, %410 : vector<2x32xf32>
    %412 = vector.extract_strided_slice %405 {offsets = [0, 32], sizes = [2, 32], strides = [1, 1]} : vector<2x128xf32> to vector<2x32xf32>
    %413 = arith.negf %412 : vector<2x32xf32>
    %414 = math.exp %413 : vector<2x32xf32>
    %cst_91 = arith.constant 1.000000e+00 : f32
    %415 = vector.broadcast %cst_91 : f32 to vector<2x32xf32>
    %416 = arith.addf %415, %414 : vector<2x32xf32>
    %417 = arith.divf %415, %416 : vector<2x32xf32>
    %418 = vector.extract_strided_slice %405 {offsets = [0, 64], sizes = [2, 32], strides = [1, 1]} : vector<2x128xf32> to vector<2x32xf32>
    %419 = math.tanh %418 : vector<2x32xf32>
    %420 = vector.extract_strided_slice %405 {offsets = [0, 96], sizes = [2, 32], strides = [1, 1]} : vector<2x128xf32> to vector<2x32xf32>
    %421 = arith.negf %420 : vector<2x32xf32>
    %422 = math.exp %421 : vector<2x32xf32>
    %cst_92 = arith.constant 1.000000e+00 : f32
    %423 = vector.broadcast %cst_92 : f32 to vector<2x32xf32>
    %424 = arith.addf %423, %422 : vector<2x32xf32>
    %425 = arith.divf %423, %424 : vector<2x32xf32>
    %426 = arith.mulf %417, %400 : vector<2x32xf32>
    %427 = arith.mulf %411, %419 : vector<2x32xf32>
    %428 = arith.addf %426, %427 : vector<2x32xf32>
    %429 = math.tanh %428 : vector<2x32xf32>
    %430 = arith.mulf %425, %429 : vector<2x32xf32>
    %431 = vector.extract_strided_slice %35 {offsets = [28, 0], sizes = [2, 128], strides = [1, 1]} : vector<32x128xf32> to vector<2x128xf32>
    %cst_93 = arith.constant dense<0.000000e+00> : vector<2x128xf32>
    %432 = tpu.matmul %430, %36, %cst_93 {dimension_numbers = #tpu.dot_dimension_numbers<[1], [0], [0], [1], [0, 0, 1, 1], [], []>} : vector<2x32xf32>, vector<32x128xf32>, vector<2x128xf32> -> vector<2x128xf32>
    %433 = arith.addf %431, %432 : vector<2x128xf32>
    %434 = vector.extract_strided_slice %433 {offsets = [0, 0], sizes = [2, 32], strides = [1, 1]} : vector<2x128xf32> to vector<2x32xf32>
    %435 = arith.negf %434 : vector<2x32xf32>
    %436 = math.exp %435 : vector<2x32xf32>
    %cst_94 = arith.constant 1.000000e+00 : f32
    %437 = vector.broadcast %cst_94 : f32 to vector<2x32xf32>
    %438 = arith.addf %437, %436 : vector<2x32xf32>
    %439 = arith.divf %437, %438 : vector<2x32xf32>
    %440 = vector.extract_strided_slice %433 {offsets = [0, 32], sizes = [2, 32], strides = [1, 1]} : vector<2x128xf32> to vector<2x32xf32>
    %441 = arith.negf %440 : vector<2x32xf32>
    %442 = math.exp %441 : vector<2x32xf32>
    %cst_95 = arith.constant 1.000000e+00 : f32
    %443 = vector.broadcast %cst_95 : f32 to vector<2x32xf32>
    %444 = arith.addf %443, %442 : vector<2x32xf32>
    %445 = arith.divf %443, %444 : vector<2x32xf32>
    %446 = vector.extract_strided_slice %433 {offsets = [0, 64], sizes = [2, 32], strides = [1, 1]} : vector<2x128xf32> to vector<2x32xf32>
    %447 = math.tanh %446 : vector<2x32xf32>
    %448 = vector.extract_strided_slice %433 {offsets = [0, 96], sizes = [2, 32], strides = [1, 1]} : vector<2x128xf32> to vector<2x32xf32>
    %449 = arith.negf %448 : vector<2x32xf32>
    %450 = math.exp %449 : vector<2x32xf32>
    %cst_96 = arith.constant 1.000000e+00 : f32
    %451 = vector.broadcast %cst_96 : f32 to vector<2x32xf32>
    %452 = arith.addf %451, %450 : vector<2x32xf32>
    %453 = arith.divf %451, %452 : vector<2x32xf32>
    %454 = arith.mulf %445, %428 : vector<2x32xf32>
    %455 = arith.mulf %439, %447 : vector<2x32xf32>
    %456 = arith.addf %454, %455 : vector<2x32xf32>
    %457 = math.tanh %456 : vector<2x32xf32>
    %458 = arith.mulf %453, %457 : vector<2x32xf32>
    %459 = vector.extract_strided_slice %35 {offsets = [30, 0], sizes = [2, 128], strides = [1, 1]} : vector<32x128xf32> to vector<2x128xf32>
    %cst_97 = arith.constant dense<0.000000e+00> : vector<2x128xf32>
    %460 = tpu.matmul %458, %36, %cst_97 {dimension_numbers = #tpu.dot_dimension_numbers<[1], [0], [0], [1], [0, 0, 1, 1], [], []>} : vector<2x32xf32>, vector<32x128xf32>, vector<2x128xf32> -> vector<2x128xf32>
    %461 = arith.addf %459, %460 : vector<2x128xf32>
    %462 = vector.extract_strided_slice %461 {offsets = [0, 0], sizes = [2, 32], strides = [1, 1]} : vector<2x128xf32> to vector<2x32xf32>
    %463 = arith.negf %462 : vector<2x32xf32>
    %464 = math.exp %463 : vector<2x32xf32>
    %cst_98 = arith.constant 1.000000e+00 : f32
    %465 = vector.broadcast %cst_98 : f32 to vector<2x32xf32>
    %466 = arith.addf %465, %464 : vector<2x32xf32>
    %467 = arith.divf %465, %466 : vector<2x32xf32>
    %468 = vector.extract_strided_slice %461 {offsets = [0, 32], sizes = [2, 32], strides = [1, 1]} : vector<2x128xf32> to vector<2x32xf32>
    %469 = arith.negf %468 : vector<2x32xf32>
    %470 = math.exp %469 : vector<2x32xf32>
    %cst_99 = arith.constant 1.000000e+00 : f32
    %471 = vector.broadcast %cst_99 : f32 to vector<2x32xf32>
    %472 = arith.addf %471, %470 : vector<2x32xf32>
    %473 = arith.divf %471, %472 : vector<2x32xf32>
    %474 = vector.extract_strided_slice %461 {offsets = [0, 64], sizes = [2, 32], strides = [1, 1]} : vector<2x128xf32> to vector<2x32xf32>
    %475 = math.tanh %474 : vector<2x32xf32>
    %476 = vector.extract_strided_slice %461 {offsets = [0, 96], sizes = [2, 32], strides = [1, 1]} : vector<2x128xf32> to vector<2x32xf32>
    %477 = arith.negf %476 : vector<2x32xf32>
    %478 = math.exp %477 : vector<2x32xf32>
    %cst_100 = arith.constant 1.000000e+00 : f32
    %479 = vector.broadcast %cst_100 : f32 to vector<2x32xf32>
    %480 = arith.addf %479, %478 : vector<2x32xf32>
    %481 = arith.divf %479, %480 : vector<2x32xf32>
    %482 = arith.mulf %473, %456 : vector<2x32xf32>
    %483 = arith.mulf %467, %475 : vector<2x32xf32>
    %484 = arith.addf %482, %483 : vector<2x32xf32>
    %485 = math.tanh %484 : vector<2x32xf32>
    %486 = arith.mulf %481, %485 : vector<2x32xf32>
    %c0_101 = arith.constant 0 : index
    %c0_102 = arith.constant 0 : index
    %487 = vector.load %arg9[%c0_101, %c0_102] : memref<32x2xf32, #tpu.memory_space<vmem>>, vector<32x2xf32>
    %cst_103 = arith.constant dense<0.000000e+00> : vector<2x2xf32>
    %488 = tpu.matmul %486, %487, %cst_103 {dimension_numbers = #tpu.dot_dimension_numbers<[1], [0], [0], [1], [0, 0, 1, 1], [], []>} : vector<2x32xf32>, vector<32x2xf32>, vector<2x2xf32> -> vector<2x2xf32>
    %c0_104 = arith.constant 0 : index
    %c0_105 = arith.constant 0 : index
    %489 = vector.load %arg10[%c0_104, %c0_105] : memref<1x2xf32, #tpu.memory_space<vmem>>, vector<1x2xf32>
    %490 = vector.broadcast %489 : vector<1x2xf32> to vector<2x2xf32>
    %491 = arith.addf %488, %490 : vector<2x2xf32>
    %cst_106 = arith.constant dense<0xFF800000> : vector<2xf32>
    %492 = vector.multi_reduction <maximumf>, %491, %cst_106 [1] : vector<2x2xf32> to vector<2xf32>
    %493 = vector.shape_cast %492 : vector<2xf32> to vector<2x1xf32>
    %494 = vector.broadcast %493 : vector<2x1xf32> to vector<2x2xf32>
    %495 = arith.subf %491, %494 : vector<2x2xf32>
    %496 = math.exp %495 : vector<2x2xf32>
    %cst_107 = arith.constant dense<0.000000e+00> : vector<2xf32>
    %497 = vector.multi_reduction <add>, %496, %cst_107 [1] : vector<2x2xf32> to vector<2xf32>
    %498 = vector.shape_cast %497 : vector<2xf32> to vector<2x1xf32>
    %499 = math.log %498 : vector<2x1xf32>
    %500 = vector.broadcast %499 : vector<2x1xf32> to vector<2x2xf32>
    %501 = arith.subf %495, %500 : vector<2x2xf32>
    %c0_108 = arith.constant 0 : index
    %c0_109 = arith.constant 0 : index
    %502 = vector.load %arg11[%c0_108, %c0_109] : memref<2x2xf32, #tpu.memory_space<vmem>>, vector<2x2xf32>
    tpu.vector_store %arg11[%c0_108, %c0_109], %501 {strides = array<i32>} : memref<2x2xf32, #tpu.memory_space<vmem>>, vector<2x2xf32>,
    return
  }
  func.func @transform_0(%arg0: i32) -> (i32, i32) {
    %c0_i32 = arith.constant 0 : i32
    %c0_i32_0 = arith.constant 0 : i32
    %c0_i32_1 = arith.constant 0 : i32
    return %c0_i32, %c0_i32_0 : i32, i32
  }
  func.func @transform_1(%arg0: i32) -> (i32, i32, i32) {
    %c0_i32 = arith.constant 0 : i32
    %c0_i32_0 = arith.constant 0 : i32
    %c0_i32_1 = arith.constant 0 : i32
    %c0_i32_2 = arith.constant 0 : i32
    return %c0_i32, %c0_i32_0, %c0_i32_1 : i32, i32, i32
  }
  func.func @transform_2(%arg0: i32) -> (i32, i32) {
    %c0_i32 = arith.constant 0 : i32
    %c0_i32_0 = arith.constant 0 : i32
    %c0_i32_1 = arith.constant 0 : i32
    return %c0_i32, %c0_i32_0 : i32, i32
  }
  func.func @transform_3(%arg0: i32) -> (i32, i32) {
    %c0_i32 = arith.constant 0 : i32
    %c0_i32_0 = arith.constant 0 : i32
    %c0_i32_1 = arith.constant 0 : i32
    return %c0_i32, %c0_i32_0 : i32, i32
  }
  func.func @transform_4(%arg0: i32) -> (i32, i32) {
    %c0_i32 = arith.constant 0 : i32
    %c0_i32_0 = arith.constant 0 : i32
    %c0_i32_1 = arith.constant 0 : i32
    return %c0_i32, %c0_i32_0 : i32, i32
  }
  func.func @transform_5(%arg0: i32) -> (i32, i32) {
    %c0_i32 = arith.constant 0 : i32
    %c0_i32_0 = arith.constant 0 : i32
    %c0_i32_1 = arith.constant 0 : i32
    return %c0_i32, %c0_i32_0 : i32, i32
  }
  func.func @transform_6(%arg0: i32) -> (i32, i32) {
    %c0_i32 = arith.constant 0 : i32
    %c0_i32_0 = arith.constant 0 : i32
    %c0_i32_1 = arith.constant 0 : i32
    return %c0_i32, %c0_i32_0 : i32, i32
  }
  func.func @transform_7(%arg0: i32) -> (i32, i32) {
    %c0_i32 = arith.constant 0 : i32
    %c0_i32_0 = arith.constant 0 : i32
    %c0_i32_1 = arith.constant 0 : i32
    return %c0_i32, %c0_i32_0 : i32, i32
  }
  func.func @transform_8(%arg0: i32) -> (i32, i32) {
    %c0_i32 = arith.constant 0 : i32
    %c0_i32_0 = arith.constant 0 : i32
    %c0_i32_1 = arith.constant 0 : i32
    return %c0_i32, %c0_i32_0 : i32, i32
  }
  func.func @transform_9(%arg0: i32) -> (i32, i32) {
    %c0_i32 = arith.constant 0 : i32
    %c0_i32_0 = arith.constant 0 : i32
    %c0_i32_1 = arith.constant 0 : i32
    return %c0_i32, %c0_i32_0 : i32, i32
  }
  func.func @transform_10(%arg0: i32) -> (i32, i32) {
    %c0_i32 = arith.constant 0 : i32
    %c0_i32_0 = arith.constant 0 : i32
    %c0_i32_1 = arith.constant 0 : i32
    return %c0_i32, %c0_i32_0 : i32, i32
  }
}

</mosaic_0001>

<bundles_post_ra>
// kernel: tpu_custom_call.1
= control target key start
LH: loop header
LB: loop body
LE: loop exit
PB: predicated region body
PF: predicated region fallthrough
CT: control target
= control target key end

     0   :  { %15 = vsyncpa [#allocation3], 0  ;;  %s3792_s0 = inlined_call_operand.vmem [shape: f32[40,32], index: 0, kind: input, shape index: {}]   ;;  %s3793_s1 = inlined_call_operand.hbm [shape: f32[5,32,48], index: 1, kind: input, shape index: {}]   ;;  %s3794_s2 = inlined_call_operand.vmem [shape: f32[1,48], index: 2, kind: input, shape index: {}]   ;;  %s3795_s3 = inlined_call_operand.vmem [shape: f32[48,128], index: 3, kind: input, shape index: {}]   ;;  %s3796_s4 = inlined_call_operand.vmem [shape: f32[32,128], index: 4, kind: input, shape index: {}]   ;;  %s3797_s5 = inlined_call_operand.vmem [shape: f32[1,128], index: 5, kind: input, shape index: {}]   ;;  %s3798_s6 = inlined_call_operand.vmem [shape: f32[2,32], index: 6, kind: input, shape index: {}]   ;;  %s3799_s7 = inlined_call_operand.vmem [shape: f32[2,32], index: 7, kind: input, shape index: {}]   ;;  %s3800_s8 = inlined_call_operand.vmem [shape: f32[32,2], index: 8, kind: input, shape index: {}]   ;;  %s3801_s9 = inlined_call_operand.vmem [shape: f32[1,2], index: 9, kind: input, shape index: {}]   ;;  %s3802_s10 = inlined_call_operand.hbm [shape: f32[2,2], index: 10, kind: output, shape index: {}]  }
   0x1   :  { %16 = vsyncpa [#allocation4], 0  ;;  %s3363_s13 = smov [#allocation2]   ;;  %s3315_s17 = scalar_lea.hbm %s3793_s1, 2560 }
   0x2   :  { %s24_s14 = sshll.u32 %s3363_s13, 4  ;;  %p3316_p0 = scmp.ne.s32.totalorder %s3793_s1, %s3315_s17  ;;  %s25_s14 = int_to_ptr.vmem [resolvable:$true] %s24_s14 }
   0x3   :  { %p3319_p1 = scmp.lt.u32.totalorder %s3315_s17, %s3793_s1 }
   0x5   :  { %p3321_p2 = pnand %p3319_p1, %p3316_p0 }
   0x7   :  { %3324 = shalt.err (!%p3321_p2)
}
   0x8   :  { %s3325_s22 = scalar_lea.vmem %s25_s14, 2560  ;;  %p3330_p4 = scmp.lt.s32.totalorder %s25_s14, %s25_s14 }
   0x9   :  { %p3326_p3 = scmp.ne.s32.totalorder %s25_s14, %s3325_s22  ;;  %p3331_p5 = scmp.lt.s32.totalorder %s3325_s22, %s3325_s22 }
   0xb   :  { %p3332_p6 = por %p3331_p5, %p3330_p4 }
   0xd   :  { %p3333_p7 = pnand %p3332_p6, %p3326_p3 }
   0xf   :  { %3336 = shalt.err (!%p3333_p7)
}
  0x10   :  { %s3364_s23 = smov 128   ;;  %s3365_s24 = smov 8  }
  0x11   :  { %30 = dma.hbm_to_vmem [thread:$0]  %s3793_s1, 2560, %s25_s14, [#allocation3], %s3364_s23, %s3364_s23, %s3365_s24  }
  0x12   :  { %3359 = dma.done.wait [#allocation3], 2560  }
  0x13   :  { %3360 = vsyncadd [#allocation3], 4294964736  ;;  %vm67_vm0 = vcmask 261120   ;;  %v63_v0 = vld [vmem:[#allocation2 + $0x20] sm:$0xff]  ;;  %v64_v1 = vld [vmem:[#allocation2 + $0x28] sm:$0xff]  ;;  %v3366_v59 = vmov 0.0|0.0  }
  0x14   :  { %v65_v2 = vld [vmem:[#allocation2 + $0x30] sm:$0xff]  ;;  %v3004_v3 = vpack.c.bf16 %v64_v1, %v63_v0  ;;  %v66_v4 = vld [vmem:[#allocation2 + $0x38] sm:$0xff]  ;;  %v58_v5 = vld [vmem:[%s3792_s0 + $0x2] sm:$0xff]  ;;  %vm3367_vm1 = vmmov 0   ;;  %v3368_v63 = vmov 0.0   ;;  %vm620_vm2 = vcmask 392192  }
  0x15   :  { %v3008_v6 = vpack.c.bf16 %v66_v4, %v65_v2  ;;  %2737 = vmatprep.mubr.msk.f32.mxu0 %vm67_vm0, %v58_v5  ;;  %v54_v7 = vld [vmem:[#allocation2] sm:$0xff]  ;;  %v55_v8 = vld [vmem:[#allocation2 + $0x8] sm:$0xff]  ;;  %v56_v10 = vld [vmem:[#allocation2 + $0x10] sm:$0xff]  ;;  %s3370_s21 = smov 32   ;;  %vm2505_vm3 = vcmask 9216  }
  0x16   :  { %3005 = vmatprep.subr.bf16.mxu0 %v3004_v3  ;;  %v3012_v9 = vpack.c.bf16 %v55_v8, %v54_v7  ;;  %v57_v11 = vld [vmem:[#allocation2 + $0x18] sm:$0xff]  ;;  %v59_v12 = vld [vmem:[%s3792_s0 + $0xa] sm:$0xff]  ;;  %v267_v15 = vld [vmem:[#allocation2 + $0x40] sm:$0xff] }
  0x17   :  { %3007 = vmatpush3.bf16.msra.mxu0 %v3004_v3  ;;  %v60_v13 = vld [vmem:[%s3792_s0 + $0x12] sm:$0xff]  ;;  %v3016_v14 = vpack.c.bf16 %v57_v11, %v56_v10  ;;  %v268_v16 = vld [vmem:[#allocation2 + $0x48] sm:$0xff]  ;;  %v61_v17 = vld [vmem:[%s3792_s0 + $0x1a] sm:$0xff] }
  0x18   :  { %3009 = vmatprep.subr.bf16.mxu0 %v3008_v6  ;;  %v607_v18 = vld [vmem:[%s3795_s3] sm:$0xff]  ;;  %v608_v19 = vld [vmem:[%s3795_s3 + $0x8] sm:$0xff]  ;;  %v3020_v21 = vpack.c.bf16 %v268_v16, %v267_v15  ;;  %v609_v23 = vld [vmem:[%s3795_s3 + $0x10] sm:$0xff] }
  0x19   :  { %v50_v20 = vld [vmem:[%s3792_s0] sm:$0xff]  ;;  %v3044_v22 = vpack.c.bf16 %v608_v19, %v607_v18  ;;  %v610_v24 = vld [vmem:[%s3795_s3 + $0x18] sm:$0xff]  ;;  %v269_v25 = vld [vmem:[#allocation2 + $0x50] sm:$0xff] }
  0x1a   :  { %v270_v26 = vld [vmem:[#allocation2 + $0x58] sm:$0xff]  ;;  %v3048_v27 = vpack.c.bf16 %v610_v24, %v609_v23  ;;  %v51_v28 = vld [vmem:[%s3792_s0 + $0x8] sm:$0xff]  ;;  %v52_v29 = vld [vmem:[%s3792_s0 + $0x10] sm:$0xff] }
  0x1b   :  { %3011 = vmatpush3.bf16.msra.mxu0 %v3008_v6  ;;  %3045 = vmatprep.subr.bf16.mxu1 %v3044_v22  ;;  %v3024_v30 = vpack.c.bf16 %v270_v26, %v269_v25  ;;  %v377_v31 = vld [vmem:[#allocation2 + $0x60] sm:$0xff]  ;;  %v378_v32 = vld [vmem:[#allocation2 + $0x68] sm:$0xff]  ;;  %v53_v33 = vld [vmem:[%s3792_s0 + $0x18] sm:$0xff] }
  0x1c   :  { %3013 = vmatprep.subr.bf16.mxu0 %v3012_v9  ;;  %3047 = vmatpush3.bf16.msra.mxu1 %v3044_v22  ;;  %v262_v34 = vld [vmem:[%s3792_s0 + $0x4] sm:$0xff]  ;;  %v3028_v35 = vpack.c.bf16 %v378_v32, %v377_v31  ;;  %v379_v36 = vld [vmem:[#allocation2 + $0x70] sm:$0xff]  ;;  %v380_v37 = vld [vmem:[#allocation2 + $0x78] sm:$0xff] }
  0x1d   :  { %3049 = vmatprep.subr.bf16.mxu1 %v3048_v27  ;;  %v263_v38 = vld [vmem:[%s3792_s0 + $0xc] sm:$0xff]  ;;  %v264_v39 = vld [vmem:[%s3792_s0 + $0x14] sm:$0xff]  ;;  %v3032_v40 = vpack.c.bf16 %v380_v37, %v379_v36  ;;  %v487_v41 = vld [vmem:[#allocation2 + $0x80] sm:$0xff] }
  0x1e   :  { %2738 = vmatmul.mubr.msk.f32.vlgmr.msra.gmra.mrb[0].mxu0 %vm67_vm0, %v59_v12  ;;  %v488_v42 = vld [vmem:[#allocation2 + $0x88] sm:$0xff]  ;;  %v265_v43 = vld [vmem:[%s3792_s0 + $0x1c] sm:$0xff]  ;;  %v489_v46 = vld [vmem:[#allocation2 + $0x90] sm:$0xff] }
  0x1f   :  { %3015 = vmatpush3.bf16.msra.mxu0 %v3012_v9  ;;  %2740 = vmatprep.mubr.msk.f32.mxu0 %vm67_vm0, %v60_v13  ;;  %v372_v44 = vld [vmem:[%s3792_s0 + $0x6] sm:$0xff]  ;;  %v3036_v45 = vpack.c.bf16 %v488_v42, %v487_v41  ;;  %v490_v47 = vld [vmem:[#allocation2 + $0x98] sm:$0xff]  ;;  %v373_v48 = vld [vmem:[%s3792_s0 + $0xe] sm:$0xff] }
  0x20   :  { %3017 = vmatprep.subr.bf16.mxu0 %v3016_v14  ;;  %3051 = vmatpush3.bf16.msra.mxu1 %v3048_v27  ;;  %v374_v49 = vld [vmem:[%s3792_s0 + $0x16] sm:$0xff]  ;;  %v3040_v50 = vpack.c.bf16 %v490_v47, %v489_v46  ;;  %v375_v51 = vld [vmem:[%s3792_s0 + $0x1e] sm:$0xff]  ;;  %v612_v54 = vld [vmem:[%s3795_s3 + $0x28] sm:$0xff] }
  0x21   :  { %v485_v52 = vld [vmem:[%s3792_s0 + $0x20] sm:$0xff]  ;;  %v719_v57 = vld [vmem:[%s3796_s4 + $0x8] sm:$0xff]  ;;  %v720_v60 = vld [vmem:[%s3796_s4 + $0x10] sm:$0xff] }
  0x22   :  { %2741 = vmatmul.mubr.msk.f32.gmra.mrb[2].mxu0 %vm67_vm0, %v61_v17  ;;  %v611_v53 = vld [vmem:[%s3795_s3 + $0x20] sm:$0xff]  ;;  %v721_v61 = vld [vmem:[%s3796_s4 + $0x18] sm:$0xff] }
  0x23   :  { %3019 = vmatpush3.bf16.msra.mxu0 %v3016_v14  ;;  %2751 = vmatprep.mubr.msk.f32.mxu0 %vm67_vm0, %v50_v20  ;;  %v3052_v55 = vpack.c.bf16 %v612_v54, %v611_v53  ;;  %v718_v56 = vld [vmem:[%s3796_s4] sm:$0xff]  ;;  %v3546_v62 = vpack.c.bf16 %v721_v61, %v720_v60 }
  0x24   :  { %3021 = vmatprep.subr.bf16.mxu0 %v3020_v21  ;;  %v3534_v58 = vpack.c.bf16 %v719_v57, %v718_v56  ;;  %v2554_v0 = vld [vmem:[%s3794_s2] ss:$0 sm:$0xff] }
  0x25   :  { %3053 = vmatprep.subr.bf16.mxu1 %v3052_v55  ;;  %v722_v13 = vld [vmem:[%s3798_s6] sm:$0x3]  ;;  %s3369_s6 = smov 64  }
  0x26   :  { %2752 = vmatmul.mubr.msk.f32.vlgmr.msra.gmra.mrb[0].mxu0 %vm67_vm0, %v51_v28  ;;  %3055 = vmatpush3.bf16.msra.mxu1 %v3052_v55  ;;  %v2555_v14 = vld [vmem:[%s3797_s5] ss:$0 sm:$0xff] }
  0x27   :  { %3023 = vmatpush3.bf16.msra.mxu0 %v3020_v21  ;;  %2754 = vmatprep.mubr.msk.f32.mxu0 %vm67_vm0, %v52_v29  ;;  %v723_v27 = vld [vmem:[%s3799_s7] sm:$0x3] }
  0x28   :  { %3025 = vmatprep.subr.bf16.mxu0 %v3024_v30  ;;  %3056 = vmatprep.subr.bf16.mxu1 %v3366_v59 }
  0x2a   :  { %2755 = vmatmul.mubr.msk.f32.gmra.mrb[2].mxu0 %vm67_vm0, %v53_v33 }
  0x2b   :  { %3027 = vmatpush3.bf16.msra.mxu0 %v3024_v30  ;;  %2765 = vmatprep.mubr.msk.f32.mxu0 %vm67_vm0, %v262_v34 }
  0x2c   :  { %3029 = vmatprep.subr.bf16.mxu0 %v3028_v35 }
  0x2e   :  { %2766 = vmatmul.mubr.msk.f32.vlgmr.msra.gmra.mrb[0].mxu0 %vm67_vm0, %v263_v38 }
  0x2f   :  { %3031 = vmatpush3.bf16.msra.mxu0 %v3028_v35  ;;  %2768 = vmatprep.mubr.msk.f32.mxu0 %vm67_vm0, %v264_v39 }
  0x30   :  { %3033 = vmatprep.subr.bf16.mxu0 %v3032_v40 }
  0x32   :  { %2769 = vmatmul.mubr.msk.f32.gmra.mrb[2].mxu0 %vm67_vm0, %v265_v43 }
  0x33   :  { %3035 = vmatpush3.bf16.msra.mxu0 %v3032_v40  ;;  %2779 = vmatprep.mubr.msk.f32.mxu0 %vm67_vm0, %v372_v44 }
  0x34   :  { %3037 = vmatprep.subr.bf16.mxu0 %v3036_v45 }
  0x36   :  { %2780 = vmatmul.mubr.msk.f32.vlgmr.msra.gmra.mrb[0].mxu0 %vm67_vm0, %v373_v48 }
  0x37   :  { %3039 = vmatpush3.bf16.msra.mxu0 %v3036_v45  ;;  %2782 = vmatprep.mubr.msk.f32.mxu0 %vm67_vm0, %v374_v49 }
  0x38   :  { %3041 = vmatprep.subr.bf16.mxu0 %v3040_v50 }
  0x3a   :  { %2783 = vmatmul.mubr.msk.f32.gmra.mrb[2].mxu0 %vm67_vm0, %v375_v51 }
  0x3b   :  { %3043 = vmatpush3.bf16.msra.mxu0 %v3040_v50  ;;  %2793 = vmatprep.mubr.msk.f32.mxu0 %vm67_vm0, %v51_v28 }
  0x3c   :  { %3080 = vmatprep.subr.bf16.mxu0 %v3366_v59 }
  0x3e   :  { %2794 = vmatmul.mubr.msk.f32.vlgmr.msra.gmra.mrb[0].mxu0 %vm67_vm0, %v52_v29 }
  0x3f   :  { %2796 = vmatprep.mubr.msk.f32.mxu0 %vm67_vm0, %v53_v33  ;;  %3082 = vmatpush3.bf16.msra.mxu0 %v3534_v58 }
  0x40   :  { %3083 = vmatprep.subr.bf16.mxu0 %v3366_v59 }
  0x42   :  { %2797 = vmatmul.mubr.msk.f32.gmra.mrb[2].mxu0 %vm67_vm0, %v485_v52 }
  0x43   :  { %3085 = vmatpush3.bf16.msra.mxu0 %v3546_v62  ;;  %2869 = vmatprep.mubr.msk.f32.mxu0 %vm3367_vm1, %v3368_v63 }
  0x44   :  { %3092 = vmatprep.subr.bf16.mxu0 %v3366_v59 }
 0x111   :  { %v2795_v1 = vpop.f32.mrb[0].mxu0 }
 0x112   :  { %v600_v2 = vadd.f32 %v2795_v1, %v2554_v0  ;;  %v569_v3 = vpop.f32.mrb[1].mxu0 }
 0x113   :  { %v599_v4 = vadd.f32 %v2554_v0, %v569_v3 }
 0x114   :  { %v604_v7 = vmax.f32 %v600_v2, 0.0 }
 0x115   :  { %v603_v5 = vmax.f32 %v599_v4, 0.0  ;;  %v2798_v6 = vpop.f32.mrb[2].mxu0 }
 0x116   :  { %v602_v8 = vadd.f32 %v2798_v6, %v2554_v0  ;;  %v579_v9 = vpop.f32.mrb[3].mxu0 }
 0x117   :  { %v601_v10 = vadd.f32 %v2554_v0, %v579_v9  ;;  %2811 = vmatprep.mubr.msk.f32.mxu1 %vm620_vm2, %v603_v5 }
 0x118   :  { %2812 = vmatmul.mubr.msk.f32.vlgmr.msra.gmra.mrb[0].mxu1 %vm620_vm2, %v604_v7  ;;  %v606_v12 = vmax.f32 %v602_v8, 0.0 }
 0x119   :  { %v605_v11 = vmax.f32 %v601_v10, 0.0  ;;  %3058 = vmatpush3.bf16.msra.mxu1 %v3534_v58 }
 0x11a   :  { %3059 = vmatprep.subr.bf16.mxu1 %v3366_v59 }
 0x11b   :  { %2814 = vmatprep.mubr.msk.f32.mxu1 %vm620_vm2, %v605_v11 }
 0x11c   :  { %2815 = vmatmul.mubr.msk.f32.gmra.mrb[2].mxu1 %vm620_vm2, %v606_v12 }
 0x11d   :  { %3061 = vmatpush3.bf16.msra.mxu1 %v3546_v62  ;;  %2825 = vmatprep.mubr.msk.f32.mxu1 %vm3367_vm1, %v3368_v63 }
 0x11e   :  { %3062 = vmatprep.subr.bf16.mxu1 %v3366_v59 }
 0x120   :  { %2826 = vmatmul.mubr.msk.f32.vlgmr.msra.gmra.mrb[4].mxu1 %vm67_vm0, %v722_v13 }
 0x121   :  { %3064 = vmatpush3.bf16.msra.mxu1 %v3534_v58  ;;  %2836 = vmatprep.mubr.msk.f32.mxu1 %vm3367_vm1, %v3368_v63 }
 0x122   :  { %3065 = vmatprep.subr.bf16.mxu1 %v3366_v59 }
 0x125   :  { %3067 = vmatpush3.bf16.msra.mxu1 %v3546_v62 }
 0x126   :  { %3068 = vmatprep.subr.bf16.mxu1 %v3366_v59 }
 0x1eb   :  { %v2813_v15 = vpop.f32.mrb[0].mxu1 }
 0x1ec   :  { %v3574_v16 = vadd.f32 %v2813_v15, %v2555_v14  ;;  %v699_v17 = vpop.f32.mrb[1].mxu1 }
 0x1ed   :  { %v3580_v22 = vadd.f32 %v2555_v14, %v699_v17 }
 0x1ef   :  { %v2816_v18 = vpop.f32.mrb[2].mxu1 }
 0x1f0   :  { %v3576_v19 = vadd.f32 %v2816_v18, %v2555_v14  ;;  %v709_v20 = vpop.f32.mrb[3].mxu1 }
 0x1f1   :  { %v3578_v21 = vadd.f32 %v2555_v14, %v709_v20 }
 0x1f3   :  { %v793_v23 = vpop.f32.mrb[4].mxu1 }
 0x1f4   :  { %v797_v24 = vadd.f32 %v793_v23, %v3580_v22  ;;  %v2827_v25 = vpop.f32.mrb[5].mxu1 }
 0x1f6   :  { %3183 = vtanh.f32 %v797_v24  ;;  %v2561_v28 = vmul.f32 -1.442695, %v797_v24 }
 0x1f8   :  { %3185 = vpow2.f32 %v2561_v28 }
 0x200   :  { %v3184_v26 = vpop.eup %3183 }
 0x201   :  { %811 = vrot.lane.b32.xlu0 %v3184_v26, %s3369_s6 }
 0x202   :  { %v3186_v29 = vpop.eup %3185 }
 0x203   :  { %v801_v30 = vadd.f32 1.0, %v3186_v29 }
 0x205   :  { %806 = vrot.lane.b32.xlu0 %v723_v27, %s3370_s21  ;;  %3187 = vrcp.f32 %v801_v30 }
 0x20f   :  { %v3188_v31 = vpop.eup %3187 }
 0x273   :  { %v812_v32 = vpop.permute.xlu0 %811 }
 0x274   :  { %v814_v33 = vmul.f32 %v3188_v31, %v812_v32 }
 0x276   :  { %816 = vrot.lane.b32.xlu1 %v814_v33, %s3370_s21 }
 0x277   :  { %v807_v34 = vpop.permute.xlu0 %806 }
 0x278   :  { %v809_v35 = vmul.f32 %v3188_v31, %v807_v34 }
 0x2e8   :  { %v817_v36 = vpop.permute.xlu1 %816 }
 0x2e9   :  { %v819_v37 = vadd.f32 %v817_v36, %v809_v35 }
 0x2eb   :  { %3189 = vtanh.f32 %v819_v37  ;;  %v913_v53 = vrot.slane %v819_v37, 6 }
 0x2f5   :  { %v3190_v38 = vpop.eup %3189 }
 0x2f6   :  { %822 = vrot.lane.b32.xlu1 %v3190_v38, %s3369_s6 }
 0x368   :  { %v823_v39 = vpop.permute.xlu1 %822 }
 0x369   :  { %v825_v40 = vmul.f32 %v3188_v31, %v823_v39 }
 0x36b   :  { %827 = vrot.lane.b32.xlu0 %v825_v40, %s3370_s21 }
 0x3dd   :  { %v828_v41 = vpop.permute.xlu0 %827 }
 0x3de   :  { %2837 = vmatmul.mubr.msk.f32.vlgmr.msra.gmra.mrb[6].mxu1 %vm67_vm0, %v828_v41 }
 0x3df   :  { %3070 = vmatpush3.bf16.msra.mxu1 %v3534_v58  ;;  %2847 = vmatprep.mubr.msk.f32.mxu1 %vm3367_vm1, %v3368_v63 }
 0x3e0   :  { %3071 = vmatprep.subr.bf16.mxu1 %v3366_v59 }
 0x3e3   :  { %3073 = vmatpush3.bf16.msra.mxu1 %v3546_v62 }
 0x3e4   :  { %3074 = vmatprep.subr.bf16.mxu1 %v3366_v59 }
 0x4b1   :  { %v897_v42 = vpop.f32.mrb[6].mxu1 }
 0x4b2   :  { %v902_v43 = vrot.slane %v897_v42, 6  ;;  %v2838_v44 = vpop.f32.mrb[7].mxu1 }
 0x4b4   :  { %v904_v45 = vadd.f32 %v902_v43, %v3580_v22 }
 0x4b6   :  { %3191 = vtanh.f32 %v904_v45  ;;  %v2563_v47 = vmul.f32 -1.442695, %v904_v45 }
 0x4b8   :  { %3193 = vpow2.f32 %v2563_v47 }
 0x4c0   :  { %v3192_v46 = vpop.eup %3191 }
 0x4c1   :  { %917 = vrot.lane.b32.xlu1 %v3192_v46, %s3369_s6 }
 0x4c2   :  { %v3194_v48 = vpop.eup %3193 }
 0x4c3   :  { %v908_v49 = vadd.f32 1.0, %v3194_v48 }
 0x4c5   :  { %3195 = vrcp.f32 %v908_v49 }
 0x4cf   :  { %v3196_v50 = vpop.eup %3195 }
 0x4d0   :  { %v915_v54 = vmul.f32 %v3196_v50, %v913_v53 }
 0x533   :  { %v918_v51 = vpop.permute.xlu1 %917 }
 0x534   :  { %v920_v52 = vmul.f32 %v3196_v50, %v918_v51 }
 0x536   :  { %922 = vrot.lane.b32.xlu0 %v920_v52, %s3370_s21 }
 0x5a8   :  { %v923_v55 = vpop.permute.xlu0 %922 }
 0x5a9   :  { %v925_v56 = vadd.f32 %v923_v55, %v915_v54 }
 0x5ab   :  { %3197 = vtanh.f32 %v925_v56  ;;  %v1020_v13 = vrot.slane %v925_v56, 6 }
 0x5b5   :  { %v3198_v57 = vpop.eup %3197 }
 0x5b6   :  { %928 = vrot.lane.b32.xlu1 %v3198_v57, %s3369_s6 }
 0x628   :  { %v929_v60 = vpop.permute.xlu1 %928 }
 0x629   :  { %v931_v61 = vmul.f32 %v3196_v50, %v929_v60 }
 0x62b   :  { %v933_v0 = vrot.slane %v931_v61, 2 }
 0x62d   :  { %934 = vrot.lane.b32.xlu0 %v933_v0, %s3370_s21 }
 0x69f   :  { %v935_v1 = vpop.permute.xlu0 %934 }
 0x6a0   :  { %2848 = vmatmul.mubr.msk.f32.vlgmr.msra.gmra.mrb[8].mxu1 %vm67_vm0, %v935_v1 }
 0x6a1   :  { %3076 = vmatpush3.bf16.msra.mxu1 %v3534_v58  ;;  %2858 = vmatprep.mubr.msk.f32.mxu1 %vm3367_vm1, %v3368_v63 }
 0x6a2   :  { %3077 = vmatprep.subr.bf16.mxu1 %v3366_v59 }
 0x6a5   :  { %3079 = vmatpush3.bf16.msra.mxu1 %v3546_v62 }
 0x6a6   :  { %3086 = vmatprep.subr.bf16.mxu1 %v3366_v59 }
 0x773   :  { %v1004_v2 = vpop.f32.mrb[8].mxu1 }
 0x774   :  { %v1009_v3 = vrot.slane %v1004_v2, 4  ;;  %v2849_v4 = vpop.f32.mrb[9].mxu1 }
 0x776   :  { %v1011_v5 = vadd.f32 %v1009_v3, %v3580_v22 }
 0x778   :  { %3199 = vtanh.f32 %v1011_v5  ;;  %v2565_v7 = vmul.f32 -1.442695, %v1011_v5 }
 0x77a   :  { %3201 = vpow2.f32 %v2565_v7 }
 0x782   :  { %v3200_v6 = vpop.eup %3199 }
 0x783   :  { %1024 = vrot.lane.b32.xlu1 %v3200_v6, %s3369_s6 }
 0x784   :  { %v3202_v8 = vpop.eup %3201 }
 0x785   :  { %v1015_v9 = vadd.f32 1.0, %v3202_v8 }
 0x787   :  { %3203 = vrcp.f32 %v1015_v9 }
 0x791   :  { %v3204_v10 = vpop.eup %3203 }
 0x792   :  { %v1022_v14 = vmul.f32 %v3204_v10, %v1020_v13 }
 0x7f5   :  { %v1025_v11 = vpop.permute.xlu1 %1024 }
 0x7f6   :  { %v1027_v12 = vmul.f32 %v3204_v10, %v1025_v11 }
 0x7f8   :  { %1029 = vrot.lane.b32.xlu0 %v1027_v12, %s3370_s21 }
 0x86a   :  { %v1030_v15 = vpop.permute.xlu0 %1029 }
 0x86b   :  { %v1032_v17 = vadd.f32 %v1030_v15, %v1022_v14 }
 0x86d   :  { %3205 = vtanh.f32 %v1032_v17  ;;  %v1127_v37 = vrot.slane %v1032_v17, 6 }
 0x877   :  { %v3206_v18 = vpop.eup %3205 }
 0x878   :  { %1035 = vrot.lane.b32.xlu1 %v3206_v18, %s3369_s6 }
 0x8ea   :  { %v1036_v20 = vpop.permute.xlu1 %1035 }
 0x8eb   :  { %v1038_v23 = vmul.f32 %v3204_v10, %v1036_v20 }
 0x8ed   :  { %v1040_v24 = vrot.slane %v1038_v23, 4 }
 0x8ef   :  { %1041 = vrot.lane.b32.xlu0 %v1040_v24, %s3370_s21 }
 0x961   :  { %v1042_v25 = vpop.permute.xlu0 %1041 }
 0x962   :  { %2859 = vmatmul.mubr.msk.f32.vlgmr.msra.gmra.mrb[10].mxu1 %vm67_vm0, %v1042_v25 }
 0x963   :  { %3088 = vmatpush3.bf16.msra.mxu1 %v3534_v58  ;;  %2880 = vmatprep.mubr.msk.f32.mxu1 %vm3367_vm1, %v3368_v63 }
 0x964   :  { %3089 = vmatprep.subr.bf16.mxu1 %v3366_v59 }
 0x967   :  { %3091 = vmatpush3.bf16.msra.mxu1 %v3546_v62 }
 0x968   :  { %3098 = vmatprep.subr.bf16.mxu1 %v3366_v59 }
 0xa35   :  { %v1111_v26 = vpop.f32.mrb[10].mxu1 }
 0xa36   :  { %v1116_v27 = vrot.slane %v1111_v26, 2  ;;  %v2860_v28 = vpop.f32.mrb[11].mxu1 }
 0xa38   :  { %v1118_v29 = vadd.f32 %v1116_v27, %v3580_v22 }
 0xa3a   :  { %3207 = vtanh.f32 %v1118_v29  ;;  %v2567_v31 = vmul.f32 -1.442695, %v1118_v29 }
 0xa3c   :  { %3209 = vpow2.f32 %v2567_v31 }
 0xa44   :  { %v3208_v30 = vpop.eup %3207 }
 0xa45   :  { %1131 = vrot.lane.b32.xlu1 %v3208_v30, %s3369_s6 }
 0xa46   :  { %v3210_v32 = vpop.eup %3209 }
 0xa47   :  { %v1122_v33 = vadd.f32 1.0, %v3210_v32 }
 0xa49   :  { %3211 = vrcp.f32 %v1122_v33 }
 0xa53   :  { %v3212_v34 = vpop.eup %3211 }
 0xa54   :  { %v1129_v38 = vmul.f32 %v3212_v34, %v1127_v37 }
 0xab7   :  { %v1132_v35 = vpop.permute.xlu1 %1131 }
 0xab8   :  { %v1134_v36 = vmul.f32 %v3212_v34, %v1132_v35 }
 0xaba   :  { %1136 = vrot.lane.b32.xlu0 %v1134_v36, %s3370_s21 }
 0xb2c   :  { %v1137_v39 = vpop.permute.xlu0 %1136 }
 0xb2d   :  { %v1139_v40 = vadd.f32 %v1137_v39, %v1129_v38 }
 0xb2f   :  { %3213 = vtanh.f32 %v1139_v40  ;;  %v1231_v55 = vrot.slane %v1139_v40, 6 }
 0xb39   :  { %v3214_v22 = vpop.eup %3213 }
 0xb3a   :  { %1142 = vrot.lane.b32.xlu1 %v3214_v22, %s3369_s6 }
 0xbac   :  { %v1143_v41 = vpop.permute.xlu1 %1142 }
 0xbad   :  { %v1145_v42 = vmul.f32 %v3212_v34, %v1143_v41 }
 0xbaf   :  { %v1147_v43 = vrot.slane %v1145_v42, 6 }
 0xbb1   :  { %1148 = vrot.lane.b32.xlu0 %v1147_v43, %s3370_s21 }
 0xc23   :  { %v1149_v44 = vpop.permute.xlu0 %1148 }
 0xc24   :  { %2870 = vmatmul.mubr.msk.f32.vlgmr.msra.gmra.mrb[4].mxu0 %vm67_vm0, %v1149_v44 }
 0xc25   :  { %3094 = vmatpush3.bf16.msra.mxu0 %v3534_v58  ;;  %2891 = vmatprep.mubr.msk.f32.mxu0 %vm3367_vm1, %v3368_v63 }
 0xc26   :  { %3095 = vmatprep.subr.bf16.mxu0 %v3366_v59 }
 0xc29   :  { %3097 = vmatpush3.bf16.msra.mxu0 %v3546_v62 }
 0xc2a   :  { %3104 = vmatprep.subr.bf16.mxu0 %v3366_v59 }
 0xcf7   :  { %v1218_v45 = vpop.f32.mrb[4].mxu0 }
 0xcf8   :  { %v1222_v46 = vadd.f32 %v1218_v45, %v3574_v16  ;;  %v2871_v47 = vpop.f32.mrb[5].mxu0 }
 0xcfa   :  { %3215 = vtanh.f32 %v1222_v46  ;;  %v2569_v49 = vmul.f32 -1.442695, %v1222_v46 }
 0xcfc   :  { %3217 = vpow2.f32 %v2569_v49 }
 0xd04   :  { %v3216_v48 = vpop.eup %3215 }
 0xd05   :  { %1235 = vrot.lane.b32.xlu1 %v3216_v48, %s3369_s6 }
 0xd06   :  { %v3218_v50 = vpop.eup %3217 }
 0xd07   :  { %v1226_v51 = vadd.f32 1.0, %v3218_v50 }
 0xd09   :  { %3219 = vrcp.f32 %v1226_v51 }
 0xd13   :  { %v3220_v52 = vpop.eup %3219 }
 0xd14   :  { %v1233_v56 = vmul.f32 %v3220_v52, %v1231_v55 }
 0xd77   :  { %v1236_v53 = vpop.permute.xlu1 %1235 }
 0xd78   :  { %v1238_v54 = vmul.f32 %v3220_v52, %v1236_v53 }
 0xd7a   :  { %1240 = vrot.lane.b32.xlu0 %v1238_v54, %s3370_s21 }
 0xdec   :  { %v1241_v57 = vpop.permute.xlu0 %1240 }
 0xded   :  { %v1243_v60 = vadd.f32 %v1241_v57, %v1233_v56 }
 0xdef   :  { %3221 = vtanh.f32 %v1243_v60  ;;  %v1337_v14 = vrot.slane %v1243_v60, 6 }
 0xdf9   :  { %v3222_v61 = vpop.eup %3221 }
 0xdfa   :  { %1246 = vrot.lane.b32.xlu1 %v3222_v61, %s3369_s6 }
 0xe6c   :  { %v1247_v0 = vpop.permute.xlu1 %1246 }
 0xe6d   :  { %v1249_v1 = vmul.f32 %v3220_v52, %v1247_v0 }
 0xe6f   :  { %1251 = vrot.lane.b32.xlu0 %v1249_v1, %s3370_s21 }
 0xee1   :  { %v1252_v2 = vpop.permute.xlu0 %1251 }
 0xee2   :  { %2881 = vmatmul.mubr.msk.f32.vlgmr.msra.gmra.mrb[12].mxu1 %vm67_vm0, %v1252_v2 }
 0xee3   :  { %3100 = vmatpush3.bf16.msra.mxu1 %v3534_v58  ;;  %2902 = vmatprep.mubr.msk.f32.mxu1 %vm3367_vm1, %v3368_v63 }
 0xee4   :  { %3101 = vmatprep.subr.bf16.mxu1 %v3366_v59 }
 0xee7   :  { %3103 = vmatpush3.bf16.msra.mxu1 %v3546_v62 }
 0xee8   :  { %3110 = vmatprep.subr.bf16.mxu1 %v3366_v59 }
 0xfb5   :  { %v1321_v3 = vpop.f32.mrb[12].mxu1 }
 0xfb6   :  { %v1326_v4 = vrot.slane %v1321_v3, 6  ;;  %v2882_v5 = vpop.f32.mrb[13].mxu1 }
 0xfb8   :  { %v1328_v6 = vadd.f32 %v1326_v4, %v3574_v16 }
 0xfba   :  { %3223 = vtanh.f32 %v1328_v6  ;;  %v2571_v8 = vmul.f32 -1.442695, %v1328_v6 }
 0xfbc   :  { %3225 = vpow2.f32 %v2571_v8 }
 0xfc4   :  { %v3224_v7 = vpop.eup %3223 }
 0xfc5   :  { %1341 = vrot.lane.b32.xlu1 %v3224_v7, %s3369_s6 }
 0xfc6   :  { %v3226_v9 = vpop.eup %3225 }
 0xfc7   :  { %v1332_v10 = vadd.f32 1.0, %v3226_v9 }
 0xfc9   :  { %3227 = vrcp.f32 %v1332_v10 }
 0xfd3   :  { %v3228_v11 = vpop.eup %3227 }
 0xfd4   :  { %v1339_v15 = vmul.f32 %v3228_v11, %v1337_v14 }
0x1037   :  { %v1342_v12 = vpop.permute.xlu1 %1341 }
0x1038   :  { %v1344_v13 = vmul.f32 %v3228_v11, %v1342_v12 }
0x103a   :  { %1346 = vrot.lane.b32.xlu0 %v1344_v13, %s3370_s21 }
0x10ac   :  { %v1347_v17 = vpop.permute.xlu0 %1346 }
0x10ad   :  { %v1349_v18 = vadd.f32 %v1347_v17, %v1339_v15 }
0x10af   :  { %3229 = vtanh.f32 %v1349_v18  ;;  %v1444_v38 = vrot.slane %v1349_v18, 6 }
0x10b9   :  { %v3230_v20 = vpop.eup %3229 }
0x10ba   :  { %1352 = vrot.lane.b32.xlu1 %v3230_v20, %s3369_s6 }
0x112c   :  { %v1353_v23 = vpop.permute.xlu1 %1352 }
0x112d   :  { %v1355_v24 = vmul.f32 %v3228_v11, %v1353_v23 }
0x112f   :  { %v1357_v25 = vrot.slane %v1355_v24, 2 }
0x1131   :  { %1358 = vrot.lane.b32.xlu0 %v1357_v25, %s3370_s21 }
0x11a3   :  { %v1359_v26 = vpop.permute.xlu0 %1358 }
0x11a4   :  { %2892 = vmatmul.mubr.msk.f32.vlgmr.msra.gmra.mrb[6].mxu0 %vm67_vm0, %v1359_v26 }
0x11a5   :  { %3106 = vmatpush3.bf16.msra.mxu0 %v3534_v58  ;;  %2913 = vmatprep.mubr.msk.f32.mxu0 %vm3367_vm1, %v3368_v63 }
0x11a6   :  { %3107 = vmatprep.subr.bf16.mxu0 %v3366_v59 }
0x11a9   :  { %3109 = vmatpush3.bf16.msra.mxu0 %v3546_v62 }
0x11aa   :  { %3116 = vmatprep.subr.bf16.mxu0 %v3366_v59 }
0x1277   :  { %v1428_v27 = vpop.f32.mrb[6].mxu0 }
0x1278   :  { %v1433_v28 = vrot.slane %v1428_v27, 4  ;;  %v2893_v29 = vpop.f32.mrb[7].mxu0 }
0x127a   :  { %v1435_v30 = vadd.f32 %v1433_v28, %v3574_v16 }
0x127c   :  { %3231 = vtanh.f32 %v1435_v30  ;;  %v2573_v32 = vmul.f32 -1.442695, %v1435_v30 }
0x127e   :  { %3233 = vpow2.f32 %v2573_v32 }
0x1286   :  { %v3232_v31 = vpop.eup %3231 }
0x1287   :  { %1448 = vrot.lane.b32.xlu1 %v3232_v31, %s3369_s6 }
0x1288   :  { %v3234_v33 = vpop.eup %3233 }
0x1289   :  { %v1439_v34 = vadd.f32 1.0, %v3234_v33 }
0x128b   :  { %3235 = vrcp.f32 %v1439_v34 }
0x1295   :  { %v3236_v35 = vpop.eup %3235 }
0x1296   :  { %v1446_v39 = vmul.f32 %v3236_v35, %v1444_v38 }
0x12f9   :  { %v1449_v36 = vpop.permute.xlu1 %1448 }
0x12fa   :  { %v1451_v37 = vmul.f32 %v3236_v35, %v1449_v36 }
0x12fc   :  { %1453 = vrot.lane.b32.xlu0 %v1451_v37, %s3370_s21 }
0x136e   :  { %v1454_v40 = vpop.permute.xlu0 %1453 }
0x136f   :  { %v1456_v22 = vadd.f32 %v1454_v40, %v1446_v39 }
0x1371   :  { %3237 = vtanh.f32 %v1456_v22  ;;  %v1551_v57 = vrot.slane %v1456_v22, 6 }
0x137b   :  { %v3238_v41 = vpop.eup %3237 }
0x137c   :  { %1459 = vrot.lane.b32.xlu1 %v3238_v41, %s3369_s6 }
0x13ee   :  { %v1460_v42 = vpop.permute.xlu1 %1459 }
0x13ef   :  { %v1462_v43 = vmul.f32 %v3236_v35, %v1460_v42 }
0x13f1   :  { %v1464_v44 = vrot.slane %v1462_v43, 4 }
0x13f3   :  { %1465 = vrot.lane.b32.xlu0 %v1464_v44, %s3370_s21 }
0x1465   :  { %v1466_v45 = vpop.permute.xlu0 %1465 }
0x1466   :  { %2903 = vmatmul.mubr.msk.f32.vlgmr.msra.gmra.mrb[14].mxu1 %vm67_vm0, %v1466_v45 }
0x1467   :  { %3112 = vmatpush3.bf16.msra.mxu1 %v3534_v58  ;;  %2924 = vmatprep.mubr.msk.f32.mxu1 %vm3367_vm1, %v3368_v63 }
0x1468   :  { %3113 = vmatprep.subr.bf16.mxu1 %v3366_v59 }
0x146b   :  { %3115 = vmatpush3.bf16.msra.mxu1 %v3546_v62 }
0x146c   :  { %3122 = vmatprep.subr.bf16.mxu1 %v3366_v59 }
0x1539   :  { %v1535_v46 = vpop.f32.mrb[14].mxu1 }
0x153a   :  { %v1540_v47 = vrot.slane %v1535_v46, 2  ;;  %v2904_v48 = vpop.f32.mrb[15].mxu1 }
0x153c   :  { %v1542_v49 = vadd.f32 %v1540_v47, %v3574_v16 }
0x153e   :  { %3239 = vtanh.f32 %v1542_v49  ;;  %v2575_v51 = vmul.f32 -1.442695, %v1542_v49 }
0x1540   :  { %3241 = vpow2.f32 %v2575_v51 }
0x1548   :  { %v3240_v50 = vpop.eup %3239 }
0x1549   :  { %1555 = vrot.lane.b32.xlu1 %v3240_v50, %s3369_s6 }
0x154a   :  { %v3242_v52 = vpop.eup %3241 }
0x154b   :  { %v1546_v53 = vadd.f32 1.0, %v3242_v52 }
0x154d   :  { %3243 = vrcp.f32 %v1546_v53 }
0x1557   :  { %v3244_v54 = vpop.eup %3243 }
0x1558   :  { %v1553_v60 = vmul.f32 %v3244_v54, %v1551_v57 }
0x15bb   :  { %v1556_v55 = vpop.permute.xlu1 %1555 }
0x15bc   :  { %v1558_v56 = vmul.f32 %v3244_v54, %v1556_v55 }
0x15be   :  { %1560 = vrot.lane.b32.xlu0 %v1558_v56, %s3370_s21 }
0x1630   :  { %v1561_v61 = vpop.permute.xlu0 %1560 }
0x1631   :  { %v1563_v0 = vadd.f32 %v1561_v61, %v1553_v60 }
0x1633   :  { %3245 = vtanh.f32 %v1563_v0  ;;  %v1655_v15 = vrot.slane %v1563_v0, 6 }
0x163d   :  { %v3246_v16 = vpop.eup %3245 }
0x163e   :  { %1566 = vrot.lane.b32.xlu1 %v3246_v16, %s3369_s6 }
0x16b0   :  { %v1567_v1 = vpop.permute.xlu1 %1566 }
0x16b1   :  { %v1569_v2 = vmul.f32 %v3244_v54, %v1567_v1 }
0x16b3   :  { %v1571_v3 = vrot.slane %v1569_v2, 6 }
0x16b5   :  { %1572 = vrot.lane.b32.xlu0 %v1571_v3, %s3370_s21 }
0x1727   :  { %v1573_v4 = vpop.permute.xlu0 %1572 }
0x1728   :  { %2914 = vmatmul.mubr.msk.f32.vlgmr.msra.gmra.mrb[8].mxu0 %vm67_vm0, %v1573_v4 }
0x1729   :  { %3118 = vmatpush3.bf16.msra.mxu0 %v3534_v58  ;;  %2935 = vmatprep.mubr.msk.f32.mxu0 %vm3367_vm1, %v3368_v63 }
0x172a   :  { %3119 = vmatprep.subr.bf16.mxu0 %v3366_v59 }
0x172d   :  { %3121 = vmatpush3.bf16.msra.mxu0 %v3546_v62 }
0x172e   :  { %3128 = vmatprep.subr.bf16.mxu0 %v3366_v59 }
0x17fb   :  { %v1642_v5 = vpop.f32.mrb[8].mxu0 }
0x17fc   :  { %v1646_v6 = vadd.f32 %v1642_v5, %v3578_v21  ;;  %v2915_v7 = vpop.f32.mrb[9].mxu0 }
0x17fe   :  { %3247 = vtanh.f32 %v1646_v6  ;;  %v2577_v9 = vmul.f32 -1.442695, %v1646_v6 }
0x1800   :  { %3249 = vpow2.f32 %v2577_v9 }
0x1808   :  { %v3248_v8 = vpop.eup %3247 }
0x1809   :  { %1659 = vrot.lane.b32.xlu1 %v3248_v8, %s3369_s6 }
0x180a   :  { %v3250_v10 = vpop.eup %3249 }
0x180b   :  { %v1650_v11 = vadd.f32 1.0, %v3250_v10 }
0x180d   :  { %3251 = vrcp.f32 %v1650_v11 }
0x1817   :  { %v3252_v12 = vpop.eup %3251 }
0x1818   :  { %v1657_v17 = vmul.f32 %v3252_v12, %v1655_v15 }
0x187b   :  { %v1660_v13 = vpop.permute.xlu1 %1659 }
0x187c   :  { %v1662_v14 = vmul.f32 %v3252_v12, %v1660_v13 }
0x187e   :  { %1664 = vrot.lane.b32.xlu0 %v1662_v14, %s3370_s21 }
0x18f0   :  { %v1665_v18 = vpop.permute.xlu0 %1664 }
0x18f1   :  { %v1667_v20 = vadd.f32 %v1665_v18, %v1657_v17 }
0x18f3   :  { %3253 = vtanh.f32 %v1667_v20  ;;  %v1761_v38 = vrot.slane %v1667_v20, 6 }
0x18fd   :  { %v3254_v23 = vpop.eup %3253 }
0x18fe   :  { %1670 = vrot.lane.b32.xlu1 %v3254_v23, %s3369_s6 }
0x1970   :  { %v1671_v24 = vpop.permute.xlu1 %1670 }
0x1971   :  { %v1673_v25 = vmul.f32 %v3252_v12, %v1671_v24 }
0x1973   :  { %1675 = vrot.lane.b32.xlu0 %v1673_v25, %s3370_s21 }
0x19e5   :  { %v1676_v26 = vpop.permute.xlu0 %1675 }
0x19e6   :  { %2925 = vmatmul.mubr.msk.f32.vlgmr.msra.gmra.mrb[16].mxu1 %vm67_vm0, %v1676_v26 }
0x19e7   :  { %3124 = vmatpush3.bf16.msra.mxu1 %v3534_v58  ;;  %2946 = vmatprep.mubr.msk.f32.mxu1 %vm3367_vm1, %v3368_v63 }
0x19e8   :  { %3125 = vmatprep.subr.bf16.mxu1 %v3366_v59 }
0x19eb   :  { %3127 = vmatpush3.bf16.msra.mxu1 %v3546_v62 }
0x19ec   :  { %3134 = vmatprep.subr.bf16.mxu1 %v3366_v59 }
0x1ab9   :  { %v1745_v27 = vpop.f32.mrb[16].mxu1 }
0x1aba   :  { %v1750_v28 = vrot.slane %v1745_v27, 6  ;;  %v2926_v29 = vpop.f32.mrb[17].mxu1 }
0x1abc   :  { %v1752_v30 = vadd.f32 %v1750_v28, %v3578_v21 }
0x1abe   :  { %3255 = vtanh.f32 %v1752_v30  ;;  %v2579_v32 = vmul.f32 -1.442695, %v1752_v30 }
0x1ac0   :  { %3257 = vpow2.f32 %v2579_v32 }
0x1ac8   :  { %v3256_v31 = vpop.eup %3255 }
0x1ac9   :  { %1765 = vrot.lane.b32.xlu1 %v3256_v31, %s3369_s6 }
0x1aca   :  { %v3258_v33 = vpop.eup %3257 }
0x1acb   :  { %v1756_v34 = vadd.f32 1.0, %v3258_v33 }
0x1acd   :  { %3259 = vrcp.f32 %v1756_v34 }
0x1ad7   :  { %v3260_v35 = vpop.eup %3259 }
0x1ad8   :  { %v1763_v39 = vmul.f32 %v3260_v35, %v1761_v38 }
0x1b3b   :  { %v1766_v36 = vpop.permute.xlu1 %1765 }
0x1b3c   :  { %v1768_v37 = vmul.f32 %v3260_v35, %v1766_v36 }
0x1b3e   :  { %1770 = vrot.lane.b32.xlu0 %v1768_v37, %s3370_s21 }
0x1bb0   :  { %v1771_v40 = vpop.permute.xlu0 %1770 }
0x1bb1   :  { %v1773_v22 = vadd.f32 %v1771_v40, %v1763_v39 }
0x1bb3   :  { %3261 = vtanh.f32 %v1773_v22  ;;  %v1868_v57 = vrot.slane %v1773_v22, 6 }
0x1bbd   :  { %v3262_v41 = vpop.eup %3261 }
0x1bbe   :  { %1776 = vrot.lane.b32.xlu1 %v3262_v41, %s3369_s6 }
0x1c30   :  { %v1777_v42 = vpop.permute.xlu1 %1776 }
0x1c31   :  { %v1779_v43 = vmul.f32 %v3260_v35, %v1777_v42 }
0x1c33   :  { %v1781_v44 = vrot.slane %v1779_v43, 2 }
0x1c35   :  { %1782 = vrot.lane.b32.xlu0 %v1781_v44, %s3370_s21 }
0x1ca7   :  { %v1783_v45 = vpop.permute.xlu0 %1782 }
0x1ca8   :  { %2936 = vmatmul.mubr.msk.f32.vlgmr.msra.gmra.mrb[10].mxu0 %vm67_vm0, %v1783_v45 }
0x1ca9   :  { %3130 = vmatpush3.bf16.msra.mxu0 %v3534_v58  ;;  %2957 = vmatprep.mubr.msk.f32.mxu0 %vm3367_vm1, %v3368_v63 }
0x1caa   :  { %3131 = vmatprep.subr.bf16.mxu0 %v3366_v59 }
0x1cad   :  { %3133 = vmatpush3.bf16.msra.mxu0 %v3546_v62 }
0x1cae   :  { %3140 = vmatprep.subr.bf16.mxu0 %v3366_v59 }
0x1d7b   :  { %v1852_v46 = vpop.f32.mrb[10].mxu0 }
0x1d7c   :  { %v1857_v47 = vrot.slane %v1852_v46, 4  ;;  %v2937_v48 = vpop.f32.mrb[11].mxu0 }
0x1d7e   :  { %v1859_v49 = vadd.f32 %v1857_v47, %v3578_v21 }
0x1d80   :  { %3263 = vtanh.f32 %v1859_v49  ;;  %v2581_v51 = vmul.f32 -1.442695, %v1859_v49 }
0x1d82   :  { %3265 = vpow2.f32 %v2581_v51 }
0x1d8a   :  { %v3264_v50 = vpop.eup %3263 }
0x1d8b   :  { %1872 = vrot.lane.b32.xlu1 %v3264_v50, %s3369_s6 }
0x1d8c   :  { %v3266_v52 = vpop.eup %3265 }
0x1d8d   :  { %v1863_v53 = vadd.f32 1.0, %v3266_v52 }
0x1d8f   :  { %3267 = vrcp.f32 %v1863_v53 }
0x1d99   :  { %v3268_v54 = vpop.eup %3267 }
0x1d9a   :  { %v1870_v60 = vmul.f32 %v3268_v54, %v1868_v57 }
0x1dfd   :  { %v1873_v55 = vpop.permute.xlu1 %1872 }
0x1dfe   :  { %v1875_v56 = vmul.f32 %v3268_v54, %v1873_v55 }
0x1e00   :  { %1877 = vrot.lane.b32.xlu0 %v1875_v56, %s3370_s21 }
0x1e72   :  { %v1878_v61 = vpop.permute.xlu0 %1877 }
0x1e73   :  { %v1880_v0 = vadd.f32 %v1878_v61, %v1870_v60 }
0x1e75   :  { %3269 = vtanh.f32 %v1880_v0  ;;  %v1975_v17 = vrot.slane %v1880_v0, 6 }
0x1e7f   :  { %v3270_v16 = vpop.eup %3269 }
0x1e80   :  { %1883 = vrot.lane.b32.xlu1 %v3270_v16, %s3369_s6 }
0x1ef2   :  { %v1884_v1 = vpop.permute.xlu1 %1883 }
0x1ef3   :  { %v1886_v2 = vmul.f32 %v3268_v54, %v1884_v1 }
0x1ef5   :  { %v1888_v3 = vrot.slane %v1886_v2, 4 }
0x1ef7   :  { %1889 = vrot.lane.b32.xlu0 %v1888_v3, %s3370_s21 }
0x1f69   :  { %v1890_v4 = vpop.permute.xlu0 %1889 }
0x1f6a   :  { %2947 = vmatmul.mubr.msk.f32.vlgmr.msra.gmra.mrb[18].mxu1 %vm67_vm0, %v1890_v4 }
0x1f6b   :  { %3136 = vmatpush3.bf16.msra.mxu1 %v3534_v58  ;;  %2968 = vmatprep.mubr.msk.f32.mxu1 %vm3367_vm1, %v3368_v63 }
0x1f6c   :  { %3137 = vmatprep.subr.bf16.mxu1 %v3366_v59 }
0x1f6f   :  { %3139 = vmatpush3.bf16.msra.mxu1 %v3546_v62 }
0x1f70   :  { %3146 = vmatprep.subr.bf16.mxu1 %v3366_v59 }
0x203d   :  { %v1959_v5 = vpop.f32.mrb[18].mxu1 }
0x203e   :  { %v1964_v6 = vrot.slane %v1959_v5, 2  ;;  %v2948_v7 = vpop.f32.mrb[19].mxu1 }
0x2040   :  { %v1966_v8 = vadd.f32 %v1964_v6, %v3578_v21 }
0x2042   :  { %3271 = vtanh.f32 %v1966_v8  ;;  %v2583_v10 = vmul.f32 -1.442695, %v1966_v8 }
0x2044   :  { %3273 = vpow2.f32 %v2583_v10 }
0x204c   :  { %v3272_v9 = vpop.eup %3271 }
0x204d   :  { %1979 = vrot.lane.b32.xlu1 %v3272_v9, %s3369_s6 }
0x204e   :  { %v3274_v11 = vpop.eup %3273 }
0x204f   :  { %v1970_v12 = vadd.f32 1.0, %v3274_v11 }
0x2051   :  { %3275 = vrcp.f32 %v1970_v12 }
0x205b   :  { %v3276_v13 = vpop.eup %3275 }
0x205c   :  { %v1977_v18 = vmul.f32 %v3276_v13, %v1975_v17 }
0x20bf   :  { %v1980_v14 = vpop.permute.xlu1 %1979 }
0x20c0   :  { %v1982_v15 = vmul.f32 %v3276_v13, %v1980_v14 }
0x20c2   :  { %1984 = vrot.lane.b32.xlu0 %v1982_v15, %s3370_s21 }
0x2134   :  { %v1985_v20 = vpop.permute.xlu0 %1984 }
0x2135   :  { %v1987_v23 = vadd.f32 %v1985_v20, %v1977_v18 }
0x2137   :  { %3277 = vtanh.f32 %v1987_v23  ;;  %v2079_v38 = vrot.slane %v1987_v23, 6 }
0x2141   :  { %v3278_v21 = vpop.eup %3277 }
0x2142   :  { %1990 = vrot.lane.b32.xlu1 %v3278_v21, %s3369_s6 }
0x21b4   :  { %v1991_v24 = vpop.permute.xlu1 %1990 }
0x21b5   :  { %v1993_v25 = vmul.f32 %v3276_v13, %v1991_v24 }
0x21b7   :  { %v1995_v26 = vrot.slane %v1993_v25, 6 }
0x21b9   :  { %1996 = vrot.lane.b32.xlu0 %v1995_v26, %s3370_s21 }
0x222b   :  { %v1997_v27 = vpop.permute.xlu0 %1996 }
0x222c   :  { %2958 = vmatmul.mubr.msk.f32.vlgmr.msra.gmra.mrb[12].mxu0 %vm67_vm0, %v1997_v27 }
0x222d   :  { %3142 = vmatpush3.bf16.msra.mxu0 %v3534_v58  ;;  %2979 = vmatprep.mubr.msk.f32.mxu0 %vm3367_vm1, %v3368_v63 }
0x222e   :  { %3143 = vmatprep.subr.bf16.mxu0 %v3366_v59 }
0x2231   :  { %3145 = vmatpush3.bf16.msra.mxu0 %v3546_v62 }
0x2232   :  { %3152 = vmatprep.subr.bf16.mxu0 %v3366_v59 }
0x22ff   :  { %v2066_v28 = vpop.f32.mrb[12].mxu0 }
0x2300   :  { %v2070_v29 = vadd.f32 %v2066_v28, %v3576_v19  ;;  %v2959_v30 = vpop.f32.mrb[13].mxu0 }
0x2302   :  { %3279 = vtanh.f32 %v2070_v29  ;;  %v2585_v32 = vmul.f32 -1.442695, %v2070_v29 }
0x2304   :  { %3281 = vpow2.f32 %v2585_v32 }
0x230c   :  { %v3280_v31 = vpop.eup %3279 }
0x230d   :  { %2083 = vrot.lane.b32.xlu1 %v3280_v31, %s3369_s6 }
0x230e   :  { %v3282_v33 = vpop.eup %3281 }
0x230f   :  { %v2074_v34 = vadd.f32 1.0, %v3282_v33 }
0x2311   :  { %3283 = vrcp.f32 %v2074_v34 }
0x231b   :  { %v3284_v35 = vpop.eup %3283 }
0x231c   :  { %v2081_v39 = vmul.f32 %v3284_v35, %v2079_v38 }
0x237f   :  { %v2084_v36 = vpop.permute.xlu1 %2083 }
0x2380   :  { %v2086_v37 = vmul.f32 %v3284_v35, %v2084_v36 }
0x2382   :  { %2088 = vrot.lane.b32.xlu0 %v2086_v37, %s3370_s21 }
0x23f4   :  { %v2089_v40 = vpop.permute.xlu0 %2088 }
0x23f5   :  { %v2091_v22 = vadd.f32 %v2089_v40, %v2081_v39  ;;  %v2419_v39 = vld [vmem:[%s3800_s8 + $0x8] sm:$0xff]  ;;  %v2420_v40 = vld [vmem:[%s3800_s8 + $0x10] sm:$0xff] }
0x23f7   :  { %3285 = vtanh.f32 %v2091_v22 }
0x2401   :  { %v3286_v41 = vpop.eup %3285 }
0x2402   :  { %2094 = vrot.lane.b32.xlu1 %v3286_v41, %s3369_s6  ;;  %v2421_v41 = vld [vmem:[%s3800_s8 + $0x18] sm:$0xff] }
0x2474   :  { %v2095_v42 = vpop.permute.xlu1 %2094 }
0x2475   :  { %v2097_v43 = vmul.f32 %v3284_v35, %v2095_v42  ;;  %v3156_v42 = vpack.c.bf16 %v2421_v41, %v2420_v40 }
0x2477   :  { %2099 = vrot.lane.b32.xlu0 %v2097_v43, %s3370_s21 }
0x24e9   :  { %v2100_v44 = vpop.permute.xlu0 %2099 }
0x24ea   :  { %2969 = vmatmul.mubr.msk.f32.vlgmr.msra.gmra.mrb[20].mxu1 %vm67_vm0, %v2100_v44 }
0x24eb   :  { %3148 = vmatpush3.bf16.msra.mxu1 %v3534_v58  ;;  %2990 = vmatprep.mubr.msk.f32.mxu1 %vm3367_vm1, %v3368_v63 }
0x24ec   :  { %3149 = vmatprep.subr.bf16.mxu1 %v3366_v59 }
0x24ef   :  { %3151 = vmatpush3.bf16.msra.mxu1 %v3546_v62  ;;  %v2185_v62 = vrot.slane %v2091_v22, 6 }
0x25bd   :  { %v2169_v45 = vpop.f32.mrb[20].mxu1 }
0x25be   :  { %v2174_v46 = vrot.slane %v2169_v45, 6  ;;  %v2970_v47 = vpop.f32.mrb[21].mxu1 }
0x25c0   :  { %v2176_v48 = vadd.f32 %v2174_v46, %v3576_v19 }
0x25c2   :  { %3287 = vtanh.f32 %v2176_v48  ;;  %v2587_v50 = vmul.f32 -1.442695, %v2176_v48  ;;  %v2592_v48 = vld [vmem:[%s3801_s9] ss:$0 sm:$0xff] }
0x25c4   :  { %3289 = vpow2.f32 %v2587_v50 }
0x25cc   :  { %v3288_v49 = vpop.eup %3287 }
0x25cd   :  { %2189 = vrot.lane.b32.xlu1 %v3288_v49, %s3369_s6 }
0x25ce   :  { %v3290_v51 = vpop.eup %3289 }
0x25cf   :  { %v2180_v58 = vadd.f32 1.0, %v3290_v51 }
0x25d1   :  { %3291 = vrcp.f32 %v2180_v58 }
0x25db   :  { %v3292_v52 = vpop.eup %3291 }
0x25dc   :  { %v2187_v55 = vmul.f32 %v3292_v52, %v2185_v62 }
0x263f   :  { %v2190_v53 = vpop.permute.xlu1 %2189 }
0x2640   :  { %v2192_v54 = vmul.f32 %v3292_v52, %v2190_v53 }
0x2642   :  { %2194 = vrot.lane.b32.xlu0 %v2192_v54, %s3370_s21 }
0x26b4   :  { %v2195_v56 = vpop.permute.xlu0 %2194 }
0x26b5   :  { %v2197_v57 = vadd.f32 %v2195_v56, %v2187_v55 }
0x26b7   :  { %3293 = vtanh.f32 %v2197_v57 }
0x26c1   :  { %v3294_v60 = vpop.eup %3293 }
0x26c2   :  { %2200 = vrot.lane.b32.xlu1 %v3294_v60, %s3369_s6 }
0x2734   :  { %v2201_v61 = vpop.permute.xlu1 %2200 }
0x2735   :  { %v2203_v0 = vmul.f32 %v3292_v52, %v2201_v61 }
0x2737   :  { %v2205_v16 = vrot.slane %v2203_v0, 2 }
0x2739   :  { %2206 = vrot.lane.b32.xlu0 %v2205_v16, %s3370_s21 }
0x27ab   :  { %v2207_v1 = vpop.permute.xlu0 %2206 }
0x27ac   :  { %2980 = vmatmul.mubr.msk.f32.vlgmr.msra.gmra.mrb[14].mxu0 %vm67_vm0, %v2207_v1 }
0x27ad   :  { %3001 = vmatprep.mubr.msk.f32.mxu0 %vm3367_vm1, %v3368_v63  ;;  %v2292_v63 = vrot.slane %v2197_v57, 6 }
0x287f   :  { %v2276_v2 = vpop.f32.mrb[14].mxu0 }
0x2880   :  { %v2281_v3 = vrot.slane %v2276_v2, 4  ;;  %v2981_v4 = vpop.f32.mrb[15].mxu0 }
0x2882   :  { %v2283_v5 = vadd.f32 %v2281_v3, %v3576_v19 }
0x2884   :  { %3295 = vtanh.f32 %v2283_v5  ;;  %v2589_v7 = vmul.f32 -1.442695, %v2283_v5 }
0x2886   :  { %3297 = vpow2.f32 %v2589_v7 }
0x288e   :  { %v3296_v6 = vpop.eup %3295 }
0x288f   :  { %2296 = vrot.lane.b32.xlu1 %v3296_v6, %s3369_s6 }
0x2890   :  { %v3298_v8 = vpop.eup %3297 }
0x2891   :  { %v2287_v9 = vadd.f32 1.0, %v3298_v8 }
0x2893   :  { %3299 = vrcp.f32 %v2287_v9 }
0x289d   :  { %v3300_v10 = vpop.eup %3299 }
0x289e   :  { %v2294_v13 = vmul.f32 %v3300_v10, %v2292_v63 }
0x2901   :  { %v2297_v11 = vpop.permute.xlu1 %2296 }
0x2902   :  { %v2299_v12 = vmul.f32 %v3300_v10, %v2297_v11 }
0x2904   :  { %2301 = vrot.lane.b32.xlu0 %v2299_v12, %s3370_s21 }
0x2976   :  { %v2302_v14 = vpop.permute.xlu0 %2301 }
0x2977   :  { %v2304_v15 = vadd.f32 %v2302_v14, %v2294_v13 }
0x2979   :  { %3301 = vtanh.f32 %v2304_v15  ;;  %v2399_v35 = vrot.slane %v2304_v15, 6 }
0x2983   :  { %v3302_v17 = vpop.eup %3301 }
0x2984   :  { %2307 = vrot.lane.b32.xlu1 %v3302_v17, %s3369_s6 }
0x29f6   :  { %v2308_v18 = vpop.permute.xlu1 %2307 }
0x29f7   :  { %v2310_v20 = vmul.f32 %v3300_v10, %v2308_v18 }
0x29f9   :  { %v2312_v23 = vrot.slane %v2310_v20, 4 }
0x29fb   :  { %2313 = vrot.lane.b32.xlu0 %v2312_v23, %s3370_s21 }
0x2a6d   :  { %v2314_v21 = vpop.permute.xlu0 %2313 }
0x2a6e   :  { %2991 = vmatmul.mubr.msk.f32.vlgmr.msra.gmra.mrb[22].mxu1 %vm67_vm0, %v2314_v21 }
0x2b41   :  { %v2383_v24 = vpop.f32.mrb[22].mxu1 }
0x2b42   :  { %v2388_v25 = vrot.slane %v2383_v24, 2  ;;  %v2992_v26 = vpop.f32.mrb[23].mxu1 }
0x2b44   :  { %v2390_v27 = vadd.f32 %v2388_v25, %v3576_v19  ;;  %v2418_v19 = vld [vmem:[%s3800_s8] sm:$0xff]  ;;  %s3371_s8 = smov [#allocation5]  }
0x2b45   :  { %v3153_v22 = vpack.c.bf16 %v2419_v39, %v2418_v19  ;;  %s2525_s9 = sshll.u32 %s3371_s8, 4  ;;  %s2526_s9 = int_to_ptr.vmem [resolvable:$true] %s2525_s9 }
0x2b46   :  { %3303 = vtanh.f32 %v2390_v27  ;;  %v2591_v29 = vmul.f32 -1.442695, %v2390_v27  ;;  %s3337_s30 = scalar_lea.vmem %s2526_s9, 32  ;;  %p3342_p9 = scmp.lt.s32.totalorder %s2526_s9, %s2526_s9 }
0x2b47   :  { %3154 = vmatpush3.bf16.msra.mxu0 %v3153_v22  ;;  %p3338_p8 = scmp.ne.s32.totalorder %s2526_s9, %s3337_s30  ;;  %p3343_p10 = scmp.lt.s32.totalorder %s3337_s30, %s3337_s30 }
0x2b48   :  { %3305 = vpow2.f32 %v2591_v29  ;;  %3155 = vmatprep.subr.bf16.mxu0 %v3366_v59 }
0x2b49   :  { %p3344_p11 = por %p3343_p10, %p3342_p9 }
0x2b4b   :  { %3157 = vmatpush3.bf16.msra.mxu0 %v3156_v42  ;;  %p3345_p12 = pnand %p3344_p11, %p3338_p8 }
0x2b50   :  { %v3304_v28 = vpop.eup %3303 }
0x2b51   :  { %2403 = vrot.lane.b32.xlu1 %v3304_v28, %s3369_s6 }
0x2b52   :  { %v3306_v30 = vpop.eup %3305 }
0x2b53   :  { %v2394_v31 = vadd.f32 1.0, %v3306_v30 }
0x2b55   :  { %3307 = vrcp.f32 %v2394_v31 }
0x2b5f   :  { %v3308_v32 = vpop.eup %3307 }
0x2b60   :  { %v2401_v36 = vmul.f32 %v3308_v32, %v2399_v35 }
0x2bc3   :  { %v2404_v33 = vpop.permute.xlu1 %2403 }
0x2bc4   :  { %v2406_v34 = vmul.f32 %v3308_v32, %v2404_v33 }
0x2bc6   :  { %2408 = vrot.lane.b32.xlu0 %v2406_v34, %s3370_s21 }
0x2c38   :  { %v2409_v37 = vpop.permute.xlu0 %2408 }
0x2c39   :  { %v2411_v38 = vadd.f32 %v2409_v37, %v2401_v36 }
0x2c3b   :  { %3309 = vtanh.f32 %v2411_v38 }
0x2c45   :  { %v3310_v43 = vpop.eup %3309 }
0x2c46   :  { %2414 = vrot.lane.b32.xlu1 %v3310_v43, %s3369_s6 }
0x2cb8   :  { %v2415_v44 = vpop.permute.xlu1 %2414 }
0x2cb9   :  { %v2417_v45 = vmul.f32 %v3308_v32, %v2415_v44 }
0x2cbb   :  { %v2430_v46 = vrot.slane %v2417_v45, 6 }
0x2cbd   :  { %2431 = vrot.lane.b32.xlu0 %v2430_v46, %s3370_s21 }
0x2d2f   :  { %v2432_v47 = vpop.permute.xlu0 %2431 }
0x2d30   :  { %3002 = vmatmul.mubr.msk.f32.vlgmr.msra.gmra.mrb[16].mxu0 %vm67_vm0, %v2432_v47 }
0x2e03   :  { %v2501_v49 = vpop.f32.mrb[16].mxu0 }
0x2e04   :  { %v2502_v50 = vadd.f32 %v2592_v48, %v2501_v49  ;;  %v3003_v59 = vpop.f32.mrb[17].mxu0 }
0x2e06   :  { %v2506_v51 = vsel %vm2505_vm3, %v2502_v50, -inf }
0x2e07   :  { %2507 = vmax.xlane.f32.xlu1 %v2506_v51 }
0x2e94   :  { %v2508_v58 = vpop.xlane.xlu1 %2507 }
0x2e95   :  { %v2509_v52 = vsub.f32 %v2502_v50, %v2508_v58 }
0x2e97   :  { %v2510_v53 = vmul.f32 1.442695, %v2509_v52 }
0x2e99   :  { %3311 = vpow2.f32 %v2510_v53 }
0x2ea3   :  { %v3312_v54 = vpop.eup %3311 }
0x2ea4   :  { %v2512_v62 = vsel %vm2505_vm3, %v3312_v54, 0.0 }
0x2ea5   :  { %2513 = vadd.xlane.f32.xlu0 %v2512_v62 }
0x2f32   :  { %v2514_v55 = vpop.xlane.xlu0 %2513 }
0x2f33   :  { %3313 = vlog2.f32 %v2514_v55 }
0x2f3d   :  { %v3314_v56 = vpop.eup %3313 }
0x2f3e   :  { %v2516_v57 = vmul.f32 0.6931472, %v3314_v56 }
0x2f40   :  { %v2517_v60 = vsub.f32 %v2509_v52, %v2516_v57 }
0x2f42   :  { %2518 = vst.msk [vmem:[#allocation5] sm:$0x3] %vm2505_vm3, %v2517_v60 }
0x2f43   :  { %3348 = shalt.err (!%p3345_p12)
}
0x2f44   :  { %s3349_s13 = scalar_lea.hbm %s3802_s10, 32 }
0x2f45   :  { %p3350_p13 = scmp.ne.s32.totalorder %s3802_s10, %s3349_s13  ;;  %p3353_p0 = scmp.lt.u32.totalorder %s3349_s13, %s3802_s10 }
0x2f47   :  { %p3355_p1 = pnand %p3353_p0, %p3350_p13 }
0x2f49   :  { %3358 = shalt.err (!%p3355_p1)
}
0x2f4a   :  { %2528 = dma.vmem_to_hbm [thread:$0]  %s2526_s9, 32, %s3802_s10, [#allocation4]  }
0x2f4b   :  { %3361 = dma.done.wait [#allocation4], 32  }
0x2f4c   :  { %3362 = vsyncadd [#allocation4], 4294967264 }
0x2f4d   :  { %2532 = vsyncpa [#allocation3], 1 }
0x2f4e   :  { %2533 = vsyncpa [#allocation4], 1 }

</bundles_post_ra>
